<compile_context>
chip_gen: v7x
topology: tpu7x:2x2x1
jax: 0.10.0
libtpu: 0.0.40
codegen_flags: <defaults>
</compile_context>

<pallas_src>
import math
import functools

import jax
import jax.numpy as jnp
from jax.experimental import pallas as pl
from jax.experimental.pallas import tpu as pltpu


def _round_up(x, m):
    return ((x + m - 1) // m) * m


def _vmem_limit_bytes():
    # 3/4 of physical VMEM, capped at 96 MiB:
    #   v7x (64 MiB/TC) -> 48 MiB, v5e/v6e (128 MiB) -> 96 MiB.
    try:
        cap = int(pltpu.get_tpu_info().vmem_capacity_bytes)
    except Exception:
        cap = 64 * 1024 * 1024  # conservative default (v7x per-TC VMEM)
    return min((cap * 3) // 4, 96 * 1024 * 1024)


def _pick_block_n(wp, dp, h, n, vmem_limit, block_n):
    # Live-VMEM footprint of one grid step, per sentence in the block:
    bytes_per_sent = (
        2 * wp * dp * 4      # f32 input tile, double-buffered
        + wp * dp * 2        # bf16 copy of the input block fed to the MXU
        + wp * h * 4         # (TN*Wp, H) tanh intermediate, f32
        + wp * 4 * 4         # score / softmax vectors
        + 2 * dp * 4         # output slab, double-buffered
    )
    weight_bytes = dp * h * 2 + 2 * h * 4      # bf16 weight + f32 bias/score vec
    budget = max(bytes_per_sent * 8, vmem_limit // 2 - weight_bytes)
    # Also cap the single-buffered input tile at ~8 MiB (no benefit beyond).
    tile_cap = max(8, (8 * 1024 * 1024) // (wp * dp * 4))
    tn_cap = max(8, (min(budget // bytes_per_sent, tile_cap) // 8) * 8)

    if block_n is None:
        tn = tn_cap
    else:
        tn = max(8, (int(block_n) // 8) * 8)
        tn = min(tn, tn_cap)                   # clamp user value to VMEM budget
    tn = min(tn, _round_up(n, 8))
    return max(8, (tn // 8) * 8)


def _sent_encoder_kernel(a_ref, wa_ref, ba_ref, ws_ref, o_ref, *, w_valid):
    # a_ref : (TN, Wp, Dp) f32  block of TN sentences, Wp (padded) words each
    # wa_ref: (Dp, H)     bf16  attn weight (already transposed: x @ wa + ba)
    # ba_ref: (1, H)      f32   attn bias
    # ws_ref: (1, H)      f32   sent weight (row vector, no bias)
    # o_ref : (TN, Dp)    attention-pooled sentence vectors (lane-dense slab)
    tn, wp, dp = a_ref.shape

    a = a_ref[...]                                                   # (TN, Wp, Dp)

    # One tall MXU matmul for the whole block: bf16 operands, f32 accumulate.
    # Wp % 8 == 0 and Dp % 128 == 0 -> this reshape is layout-free.
    a2 = a.reshape(tn * wp, dp)
    h = jnp.tanh(
        jnp.dot(a2.astype(jnp.bfloat16), wa_ref[...],
                preferred_element_type=jnp.float32)
        + ba_ref[...]
    )                                                                # (TN*Wp, H)

    # scores: H -> 1 as VPU multiply + lane (XLU) reduce, not a skinny matmul.
    s = jnp.sum(h * ws_ref[...], axis=-1, keepdims=True)             # (TN*Wp, 1)
    s = s.reshape(tn, wp, 1)                                         # (TN, Wp, 1)

    # Padded word positions (if any) must not receive softmax mass.
    if w_valid != wp:
        word_idx = jax.lax.broadcasted_iota(jnp.int32, (tn, wp, 1), 1)
        s = jnp.where(word_idx < w_valid, s, jnp.float32(-1e30))

    # softmax over the word axis (dim=1 in the PyTorch code), per sentence.
    s = s - jnp.max(s, axis=1, keepdims=True)
    e = jnp.exp(s)
    inv = pl.reciprocal(jnp.sum(e, axis=1, keepdims=True), approx=True)
    p = e * inv                                                      # (TN, Wp, 1)

    # pooled = softmax(scores)^T @ a -> (TN, Dp): broadcast mul + sublane reduce.
    o_ref[...] = jnp.sum(p * a, axis=1).astype(o_ref.dtype)


def sent_encoder(a_fus, wa, ba, ws, words1, block_n=None):
    """words1 = (B, S, W) — mirrors the PyTorch `words1` size tuple."""
    B, S, W = words1
    D = a_fus.shape[-1]
    H = wa.shape[-1]
    out_dtype = a_fus.dtype

    a = a_fus.reshape(-1, W, D).astype(jnp.float32)   # (N, W, D)
    N = a.shape[0]

    # Layout padding: W -> multiple of 8 (sublane), D -> multiple of 128 (lane).
    Wp = _round_up(W, 8)
    Dp = _round_up(D, 128)
    if Wp != W or Dp != D:
        a = jnp.pad(a, ((0, 0), (0, Wp - W), (0, Dp - D)))
    wa_p = wa if Dp == D else jnp.pad(wa, ((0, Dp - D), (0, 0)))
    wa_p = wa_p.astype(jnp.bfloat16)                  # stored once in bf16 (MXU-native)
    ba_p = ba.astype(jnp.float32)
    ws_p = ws.astype(jnp.float32)

    vmem_limit = _vmem_limit_bytes()
    tn = _pick_block_n(Wp, Dp, H, N, vmem_limit, block_n)

    # Pad N up to a multiple of TN (padded rows are zeros; sliced off below).
    n_pad = _round_up(max(N, tn), tn)
    if n_pad != N:
        a = jnp.pad(a, ((0, n_pad - N), (0, 0), (0, 0)))

    kernel = functools.partial(_sent_encoder_kernel, w_valid=W)

    def run(single_buffer_weights):
        # Grid-invariant operands don't need double buffering.
        wkw = dict(pipeline_mode=pl.Buffered(1)) if single_buffer_weights else {}
        in_specs = [
            pl.BlockSpec((tn, Wp, Dp), lambda n: (n, 0, 0)),
            pl.BlockSpec((Dp, H), lambda n: (0, 0), **wkw),
            pl.BlockSpec((1, H), lambda n: (0, 0), **wkw),
            pl.BlockSpec((1, H), lambda n: (0, 0), **wkw),
        ]
        return pl.pallas_call(
            kernel,
            out_shape=jax.ShapeDtypeStruct((n_pad, Dp), out_dtype),
            grid_spec=pltpu.PrefetchScalarGridSpec(
                num_scalar_prefetch=0,
                grid=(n_pad // tn,),
                in_specs=in_specs,
                out_specs=pl.BlockSpec((tn, Dp), lambda n: (n, 0)),
            ),
            compiler_params=pltpu.CompilerParams(
                dimension_semantics=("parallel",),   # blocks independent -> 2 TCs on v7x
                vmem_limit_bytes=vmem_limit,
            ),
        )(a, wa_p, ba_p, ws_p)

    try:
        out = run(True)
    except Exception:
        # Fallback if this JAX build rejects pl.Buffered(1) on pallas_call specs.
        out = run(False)

    return out[:N, :D].reshape(B, -1, D)              # (B, S, D)


def _reference(a_fus, wa, ba, ws, words1):
    B, S, W = words1
    D = a_fus.shape[-1]
    a = a_fus.reshape(-1, W, D)
    attn = jnp.tanh(jnp.einsum("nwd,dh->nwh", a, wa) + ba)            # (N,W,H)
    scores = jnp.einsum("nwh,h->nw", attn, ws[0])[..., None]          # (N,W,1)
    p = jax.nn.softmax(scores, axis=1)                                # (N,W,1)
    sent = jnp.einsum("nwo,nwd->nod", p, a)                           # (N,1,D)
    return sent.reshape(B, -1, D)


def _make_params(key, D, H):
    k_wa, k_ba, k_ws = jax.random.split(key, 3)
    bound_a = 1.0 / math.sqrt(D)
    wa = jax.random.uniform(k_wa, (D, H), jnp.float32, -bound_a, bound_a)  # attn.weight.T
    ba = jax.random.uniform(k_ba, (1, H), jnp.float32, -bound_a, bound_a)  # attn.bias
    bound_s = 1.0 / math.sqrt(H)
    ws = jax.random.uniform(k_ws, (1, H), jnp.float32, -bound_s, bound_s)  # sent.weight
    return wa, ba, ws


if __name__ == "__main__":
    key = jax.random.PRNGKey(0)
    k0, k1, k2 = jax.random.split(key, 3)

    # bf16 MXU operands vs f32 reference -> slightly looser tolerance.
    TOL = dict(atol=2e-2, rtol=2e-2)

    # Case 1: aligned-friendly shapes (W multiple of 8), single block + N-padding.
    B, S, W, D, H = 2, 5, 8, 32, 32
    words1 = (B, S, W)
    a_fus = jax.random.normal(k0, (B, S, W, D), dtype=jnp.float32)
    wa, ba, ws = _make_params(k1, D, H)
    ref = _reference(a_fus, wa, ba, ws, words1)

    out = jax.block_until_ready(sent_encoder(a_fus, wa, ba, ws, words1))
    assert out.shape == (B, S, D), out.shape
    assert jnp.allclose(out, ref, **TOL), "mismatch vs reference"

    # Forced small block: exercises multi-step grid + tail padding path.
    out2 = jax.block_until_ready(sent_encoder(a_fus, wa, ba, ws, words1, block_n=8))
    assert out2.shape == (B, S, D), out2.shape
    assert jnp.allclose(out2, ref, **TOL), "mismatch vs reference (tiled)"

    # Case 2: unaligned W and D -> exercises W-padding + score masking + D lane-padding.
    B2, S2, W2, D2, H2 = 2, 3, 5, 20, 16
    words2 = (B2, S2, W2)
    a_fus2 = jax.random.normal(k2, (B2, S2, W2, D2), dtype=jnp.float32)
    wa2, ba2, ws2 = _make_params(k1, D2, H2)
    ref2 = _reference(a_fus2, wa2, ba2, ws2, words2)

    out3 = jax.block_until_ready(sent_encoder(a_fus2, wa2, ba2, ws2, words2))
    assert out3.shape == (B2, S2, D2), out3.shape
    assert jnp.allclose(out3, ref2, **TOL), "mismatch vs reference (padded W/D)"

    print("KERNEL_OK")
</pallas_src>

<mosaic_0001>
module attributes {stable_mosaic.version = 11 : i64} {
  func.func @_sent_encoder_kernel(%arg0: i32, %arg1: memref<16x8x128xf32, #tpu.memory_space<vmem>>, %arg2: memref<128x32xbf16, #tpu.memory_space<vmem>>, %arg3: memref<1x32xf32, #tpu.memory_space<vmem>>, %arg4: memref<1x32xf32, #tpu.memory_space<vmem>>, %arg5: memref<16x128xf32, #tpu.memory_space<vmem>>) attributes {dimension_semantics = [#tpu.dimension_semantics<parallel>], iteration_bounds = array<i64: 1>, scalar_prefetch = 0 : i64, scratch_operands = 0 : i64, tpu.core_type = #tpu.core_type<tc>, window_params = [{transform_indices = @transform_0, window_bounds = array<i64: 16, 8, 128>}, {pipeline_mode = #tpu.pipeline_mode<synchronous>, transform_indices = @transform_1, window_bounds = array<i64: 128, 32>}, {pipeline_mode = #tpu.pipeline_mode<synchronous>, transform_indices = @transform_2, window_bounds = array<i64: 1, 32>}, {pipeline_mode = #tpu.pipeline_mode<synchronous>, transform_indices = @transform_3, window_bounds = array<i64: 1, 32>}, {transform_indices = @transform_4, window_bounds = array<i64: 16, 128>}]} {
    %c0 = arith.constant 0 : index
    %c0_0 = arith.constant 0 : index
    %c0_1 = arith.constant 0 : index
    %0 = vector.load %arg1[%c0, %c0_0, %c0_1] : memref<16x8x128xf32, #tpu.memory_space<vmem>>, vector<16x8x128xf32>
    %1 = vector.shape_cast %0 : vector<16x8x128xf32> to vector<128x128xf32>
    %2 = arith.truncf %1 : vector<128x128xf32> to vector<128x128xbf16>
    %c0_2 = arith.constant 0 : index
    %c0_3 = arith.constant 0 : index
    %3 = vector.load %arg2[%c0_2, %c0_3] : memref<128x32xbf16, #tpu.memory_space<vmem>>, vector<128x32xbf16>
    %cst = arith.constant dense<0.000000e+00> : vector<128x32xf32>
    %4 = tpu.matmul %2, %3, %cst {dimension_numbers = #tpu.dot_dimension_numbers<[1], [0], [0], [1], [0, 0, 1, 1], [], []>} : vector<128x128xbf16>, vector<128x32xbf16>, vector<128x32xf32> -> vector<128x32xf32>
    %c0_4 = arith.constant 0 : index
    %c0_5 = arith.constant 0 : index
    %5 = vector.load %arg3[%c0_4, %c0_5] : memref<1x32xf32, #tpu.memory_space<vmem>>, vector<1x32xf32>
    %6 = vector.broadcast %5 : vector<1x32xf32> to vector<128x32xf32>
    %7 = arith.addf %4, %6 : vector<128x32xf32>
    %8 = math.tanh %7 : vector<128x32xf32>
    %c0_6 = arith.constant 0 : index
    %c0_7 = arith.constant 0 : index
    %9 = vector.load %arg4[%c0_6, %c0_7] : memref<1x32xf32, #tpu.memory_space<vmem>>, vector<1x32xf32>
    %10 = vector.broadcast %9 : vector<1x32xf32> to vector<128x32xf32>
    %11 = arith.mulf %8, %10 : vector<128x32xf32>
    %cst_8 = arith.constant dense<0.000000e+00> : vector<128xf32>
    %12 = vector.multi_reduction <add>, %11, %cst_8 [1] : vector<128x32xf32> to vector<128xf32>
    %13 = vector.shape_cast %12 : vector<128xf32> to vector<128x1xf32>
    %14 = vector.shape_cast %13 : vector<128x1xf32> to vector<16x8x1xf32>
    %cst_9 = arith.constant dense<0xFF800000> : vector<16x1xf32>
    %15 = vector.multi_reduction <maximumf>, %14, %cst_9 [1] : vector<16x8x1xf32> to vector<16x1xf32>
    %16 = vector.shape_cast %15 : vector<16x1xf32> to vector<16x1x1xf32>
    %17 = vector.broadcast %16 : vector<16x1x1xf32> to vector<16x8x1xf32>
    %18 = arith.subf %14, %17 : vector<16x8x1xf32>
    %19 = math.exp %18 : vector<16x8x1xf32>
    %cst_10 = arith.constant dense<0.000000e+00> : vector<16x1xf32>
    %20 = vector.multi_reduction <add>, %19, %cst_10 [1] : vector<16x8x1xf32> to vector<16x1xf32>
    %21 = vector.shape_cast %20 : vector<16x1xf32> to vector<16x1x1xf32>
    %22 = tpu.reciprocal %21 {approx = true} : vector<16x1x1xf32> -> vector<16x1x1xf32>
    %23 = vector.broadcast %22 : vector<16x1x1xf32> to vector<16x8x1xf32>
    %24 = arith.mulf %19, %23 : vector<16x8x1xf32>
    %25 = vector.broadcast %24 : vector<16x8x1xf32> to vector<16x8x128xf32>
    %26 = arith.mulf %25, %0 : vector<16x8x128xf32>
    %cst_11 = arith.constant dense<0.000000e+00> : vector<16x128xf32>
    %27 = vector.multi_reduction <add>, %26, %cst_11 [1] : vector<16x8x128xf32> to vector<16x128xf32>
    %c0_12 = arith.constant 0 : index
    %c0_13 = arith.constant 0 : index
    %28 = vector.load %arg5[%c0_12, %c0_13] : memref<16x128xf32, #tpu.memory_space<vmem>>, vector<16x128xf32>
    tpu.vector_store %arg5[%c0_12, %c0_13], %27 {strides = array<i32>} : memref<16x128xf32, #tpu.memory_space<vmem>>, vector<16x128xf32>,
    return
  }
  func.func @transform_0(%arg0: i32) -> (i32, i32, i32) {
    %c0_i32 = arith.constant 0 : i32
    %c0_i32_0 = arith.constant 0 : i32
    %c0_i32_1 = arith.constant 0 : i32
    return %arg0, %c0_i32, %c0_i32_0 : i32, i32, i32
  }
  func.func @transform_1(%arg0: i32) -> (i32, i32) {
    %c0_i32 = arith.constant 0 : i32
    %c0_i32_0 = arith.constant 0 : i32
    %c0_i32_1 = arith.constant 0 : i32
    return %c0_i32, %c0_i32_0 : i32, i32
  }
  func.func @transform_2(%arg0: i32) -> (i32, i32) {
    %c0_i32 = arith.constant 0 : i32
    %c0_i32_0 = arith.constant 0 : i32
    %c0_i32_1 = arith.constant 0 : i32
    return %c0_i32, %c0_i32_0 : i32, i32
  }
  func.func @transform_3(%arg0: i32) -> (i32, i32) {
    %c0_i32 = arith.constant 0 : i32
    %c0_i32_0 = arith.constant 0 : i32
    %c0_i32_1 = arith.constant 0 : i32
    return %c0_i32, %c0_i32_0 : i32, i32
  }
  func.func @transform_4(%arg0: i32) -> (i32, i32) {
    %c0_i32 = arith.constant 0 : i32
    %c0_i32_0 = arith.constant 0 : i32
    return %arg0, %c0_i32 : i32, i32
  }
}

module attributes {stable_mosaic.version = 11 : i64} {
  func.func @_sent_encoder_kernel(%arg0: i32, %arg1: memref<16x8x128xf32, #tpu.memory_space<vmem>>, %arg2: memref<128x32xbf16, #tpu.memory_space<vmem>>, %arg3: memref<1x32xf32, #tpu.memory_space<vmem>>, %arg4: memref<1x32xf32, #tpu.memory_space<vmem>>, %arg5: memref<16x128xf32, #tpu.memory_space<vmem>>) attributes {dimension_semantics = [#tpu.dimension_semantics<parallel>], iteration_bounds = array<i64: 1>, scalar_prefetch = 0 : i64, scratch_operands = 0 : i64, tpu.core_type = #tpu.core_type<tc>, window_params = [{transform_indices = @transform_0, window_bounds = array<i64: 16, 8, 128>}, {pipeline_mode = #tpu.pipeline_mode<synchronous>, transform_indices = @transform_1, window_bounds = array<i64: 128, 32>}, {pipeline_mode = #tpu.pipeline_mode<synchronous>, transform_indices = @transform_2, window_bounds = array<i64: 1, 32>}, {pipeline_mode = #tpu.pipeline_mode<synchronous>, transform_indices = @transform_3, window_bounds = array<i64: 1, 32>}, {transform_indices = @transform_4, window_bounds = array<i64: 16, 128>}]} {
    %c0 = arith.constant 0 : index
    %c0_0 = arith.constant 0 : index
    %c0_1 = arith.constant 0 : index
    %0 = vector.load %arg1[%c0, %c0_0, %c0_1] : memref<16x8x128xf32, #tpu.memory_space<vmem>>, vector<16x8x128xf32>
    %1 = vector.shape_cast %0 : vector<16x8x128xf32> to vector<128x128xf32>
    %2 = arith.truncf %1 : vector<128x128xf32> to vector<128x128xbf16>
    %c0_2 = arith.constant 0 : index
    %c0_3 = arith.constant 0 : index
    %3 = vector.load %arg2[%c0_2, %c0_3] : memref<128x32xbf16, #tpu.memory_space<vmem>>, vector<128x32xbf16>
    %cst = arith.constant dense<0.000000e+00> : vector<128x32xf32>
    %4 = tpu.matmul %2, %3, %cst {dimension_numbers = #tpu.dot_dimension_numbers<[1], [0], [0], [1], [0, 0, 1, 1], [], []>} : vector<128x128xbf16>, vector<128x32xbf16>, vector<128x32xf32> -> vector<128x32xf32>
    %c0_4 = arith.constant 0 : index
    %c0_5 = arith.constant 0 : index
    %5 = vector.load %arg3[%c0_4, %c0_5] : memref<1x32xf32, #tpu.memory_space<vmem>>, vector<1x32xf32>
    %6 = vector.broadcast %5 : vector<1x32xf32> to vector<128x32xf32>
    %7 = arith.addf %4, %6 : vector<128x32xf32>
    %8 = math.tanh %7 : vector<128x32xf32>
    %c0_6 = arith.constant 0 : index
    %c0_7 = arith.constant 0 : index
    %9 = vector.load %arg4[%c0_6, %c0_7] : memref<1x32xf32, #tpu.memory_space<vmem>>, vector<1x32xf32>
    %10 = vector.broadcast %9 : vector<1x32xf32> to vector<128x32xf32>
    %11 = arith.mulf %8, %10 : vector<128x32xf32>
    %cst_8 = arith.constant dense<0.000000e+00> : vector<128xf32>
    %12 = vector.multi_reduction <add>, %11, %cst_8 [1] : vector<128x32xf32> to vector<128xf32>
    %13 = vector.shape_cast %12 : vector<128xf32> to vector<128x1xf32>
    %14 = vector.shape_cast %13 : vector<128x1xf32> to vector<16x8x1xf32>
    %cst_9 = arith.constant dense<0xFF800000> : vector<16x1xf32>
    %15 = vector.multi_reduction <maximumf>, %14, %cst_9 [1] : vector<16x8x1xf32> to vector<16x1xf32>
    %16 = vector.shape_cast %15 : vector<16x1xf32> to vector<16x1x1xf32>
    %17 = vector.broadcast %16 : vector<16x1x1xf32> to vector<16x8x1xf32>
    %18 = arith.subf %14, %17 : vector<16x8x1xf32>
    %19 = math.exp %18 : vector<16x8x1xf32>
    %cst_10 = arith.constant dense<0.000000e+00> : vector<16x1xf32>
    %20 = vector.multi_reduction <add>, %19, %cst_10 [1] : vector<16x8x1xf32> to vector<16x1xf32>
    %21 = vector.shape_cast %20 : vector<16x1xf32> to vector<16x1x1xf32>
    %22 = tpu.reciprocal %21 {approx = true} : vector<16x1x1xf32> -> vector<16x1x1xf32>
    %23 = vector.broadcast %22 : vector<16x1x1xf32> to vector<16x8x1xf32>
    %24 = arith.mulf %19, %23 : vector<16x8x1xf32>
    %25 = vector.broadcast %24 : vector<16x8x1xf32> to vector<16x8x128xf32>
    %26 = arith.mulf %25, %0 : vector<16x8x128xf32>
    %cst_11 = arith.constant dense<0.000000e+00> : vector<16x128xf32>
    %27 = vector.multi_reduction <add>, %26, %cst_11 [1] : vector<16x8x128xf32> to vector<16x128xf32>
    %c0_12 = arith.constant 0 : index
    %c0_13 = arith.constant 0 : index
    %28 = vector.load %arg5[%c0_12, %c0_13] : memref<16x128xf32, #tpu.memory_space<vmem>>, vector<16x128xf32>
    tpu.vector_store %arg5[%c0_12, %c0_13], %27 {strides = array<i32>} : memref<16x128xf32, #tpu.memory_space<vmem>>, vector<16x128xf32>,
    return
  }
  func.func @transform_0(%arg0: i32) -> (i32, i32, i32) {
    %c0_i32 = arith.constant 0 : i32
    %c0_i32_0 = arith.constant 0 : i32
    %c0_i32_1 = arith.constant 0 : i32
    return %arg0, %c0_i32, %c0_i32_0 : i32, i32, i32
  }
  func.func @transform_1(%arg0: i32) -> (i32, i32) {
    %c0_i32 = arith.constant 0 : i32
    %c0_i32_0 = arith.constant 0 : i32
    %c0_i32_1 = arith.constant 0 : i32
    return %c0_i32, %c0_i32_0 : i32, i32
  }
  func.func @transform_2(%arg0: i32) -> (i32, i32) {
    %c0_i32 = arith.constant 0 : i32
    %c0_i32_0 = arith.constant 0 : i32
    %c0_i32_1 = arith.constant 0 : i32
    return %c0_i32, %c0_i32_0 : i32, i32
  }
  func.func @transform_3(%arg0: i32) -> (i32, i32) {
    %c0_i32 = arith.constant 0 : i32
    %c0_i32_0 = arith.constant 0 : i32
    %c0_i32_1 = arith.constant 0 : i32
    return %c0_i32, %c0_i32_0 : i32, i32
  }
  func.func @transform_4(%arg0: i32) -> (i32, i32) {
    %c0_i32 = arith.constant 0 : i32
    %c0_i32_0 = arith.constant 0 : i32
    return %arg0, %c0_i32 : i32, i32
  }
}

</mosaic_0001>

<bundles_post_ra>
// kernel: tpu_custom_call.1
= control target key start
LH: loop header
LB: loop body
LE: loop exit
PB: predicated region body
PF: predicated region fallthrough
CT: control target
= control target key end

     0   :  { %9 = vsyncpa [#allocation3], 0  ;;  %s1323_s0 = inlined_call_operand.hbm [shape: f32[16,8,128], index: 0, kind: input, shape index: {}]   ;;  %s1324_s1 = inlined_call_operand.vmem [shape: bf16[128,32], index: 1, kind: input, shape index: {}]   ;;  %s1325_s2 = inlined_call_operand.vmem [shape: f32[1,32], index: 2, kind: input, shape index: {}]   ;;  %s1326_s3 = inlined_call_operand.vmem [shape: f32[1,32], index: 3, kind: input, shape index: {}]   ;;  %s1327_s4 = inlined_call_operand.hbm [shape: f32[16,128], index: 4, kind: output, shape index: {}]  }
   0x1   :  { %10 = vsyncpa [#allocation4], 0  ;;  %s988_s15 = smov [#allocation2]   ;;  %s940_s19 = scalar_lea.hbm %s1323_s0, 2048 }
   0x2   :  { %s16_s16 = sshll.u32 %s988_s15, 4  ;;  %p941_p0 = scmp.ne.s32.totalorder %s1323_s0, %s940_s19  ;;  %s17_s16 = int_to_ptr.vmem [resolvable:$true] %s16_s16 }
   0x3   :  { %p944_p1 = scmp.lt.u32.totalorder %s940_s19, %s1323_s0 }
   0x5   :  { %p946_p2 = pnand %p944_p1, %p941_p0 }
   0x7   :  { %949 = shalt.err (!%p946_p2)
}
   0x8   :  { %s950_s24 = scalar_lea.vmem %s17_s16, 2048  ;;  %p955_p4 = scmp.lt.s32.totalorder %s17_s16, %s17_s16 }
   0x9   :  { %p951_p3 = scmp.ne.s32.totalorder %s17_s16, %s950_s24  ;;  %p956_p5 = scmp.lt.s32.totalorder %s950_s24, %s950_s24 }
   0xb   :  { %p957_p6 = por %p956_p5, %p955_p4 }
   0xd   :  { %p958_p7 = pnand %p957_p6, %p951_p3 }
   0xf   :  { %961 = shalt.err (!%p958_p7)
}
  0x10   :  { %s989_s25 = smov 128   ;;  %s990_s26 = smov 8  }
  0x11   :  { %22 = dma.hbm_to_vmem [thread:$0]  %s1323_s0, 2048, %s17_s16, [#allocation3], %s989_s25, %s989_s25, %s990_s26  }
  0x12   :  { %984 = dma.done.wait [#allocation3], 2048  }
  0x13   :  { %985 = vsyncadd [#allocation3], 4294965248  ;;  %v833_v0 = vld [vmem:[%s1324_s1] sm:$0xff]   ;;  %v834_v1 = vld [vmem:[%s1324_s1 + $0x8] sm:$0xff]   ;;  %vm264_vm0 = vcmask 261120   ;;  %vm713_vm1 = vcmask 1041409  }
  0x14   :  { %781 = vmatprep.subr.bf16.mxu0 %v833_v0  ;;  %813 = vmatprep.subr.bf16.mxu1 %v833_v0  ;;  %v835_v2 = vld [vmem:[%s1324_s1 + $0x10] sm:$0xff]   ;;  %v836_v3 = vld [vmem:[%s1324_s1 + $0x18] sm:$0xff]   ;;  %v1044_v4 = vld [vmem:[#allocation2] sm:$0xff]  ;;  %vm715_vm2 = vcmask 1042434   ;;  %vm717_vm3 = vcmask 1043459   ;;  %vm719_vm4 = vcmask 1044484  }
  0x15   :  { %782 = vmatpush3.bf16.msra.mxu0 %v833_v0  ;;  %821 = vmatpush3.bf16.msra.mxu1 %v833_v0  ;;  %v1046_v5 = vld [vmem:[#allocation2 + $0x8] sm:$0xff]  ;;  %v1048_v6 = vld [vmem:[#allocation2 + $0x40] sm:$0xff]  ;;  %v839_v12 = vld [vmem:[%s1324_s1 + $0x30] sm:$0xff]   ;;  %vm721_vm5 = vcmask 1045509   ;;  %vm723_vm6 = vcmask 1046534   ;;  %vm725_vm7 = vcmask 1047559  }
  0x16   :  { %783 = vmatprep.subr.bf16.mxu0 %v834_v1  ;;  %814 = vmatprep.subr.bf16.mxu1 %v834_v1  ;;  %v49_v7 = vpack.c.bf16 %v1046_v5, %v1044_v4  ;;  %v1052_v8 = vld [vmem:[#allocation2 + $0x48] sm:$0xff]  ;;  %v837_v10 = vld [vmem:[%s1324_s1 + $0x20] sm:$0xff]   ;;  %v840_v13 = vld [vmem:[%s1324_s1 + $0x38] sm:$0xff]  }
  0x17   :  { %v53_v9 = vpack.c.bf16 %v1052_v8, %v1048_v6  ;;  %v838_v11 = vld [vmem:[%s1324_s1 + $0x28] sm:$0xff]   ;;  %v1068_v14 = vld [vmem:[#allocation2 + $0x10] sm:$0xff]  ;;  %v1070_v15 = vld [vmem:[#allocation2 + $0x18] sm:$0xff] }
  0x18   :  { %797 = vmatprep.mubr.bf16.mxu0 %v49_v7  ;;  %v1072_v16 = vld [vmem:[#allocation2 + $0x50] sm:$0xff]  ;;  %v1074_v17 = vld [vmem:[#allocation2 + $0x58] sm:$0xff]  ;;  %v1076_v18 = vld [vmem:[#allocation2 + $0x20] sm:$0xff]  ;;  %v50_v22 = vpack.c.bf16 %v1070_v15, %v1068_v14 }
  0x19   :  { %784 = vmatpush3.bf16.msra.mxu0 %v834_v1  ;;  %822 = vmatpush3.bf16.msra.mxu1 %v834_v1  ;;  %v38_v19 = vld [vmem:[#allocation2 + $0x28] sm:$0xff]  ;;  %v1078_v20 = vld [vmem:[#allocation2 + $0x60] sm:$0xff]  ;;  %v54_v23 = vpack.c.bf16 %v1074_v17, %v1072_v16  ;;  %v1089_v26 = vld [vmem:[#allocation2 + $0x30] sm:$0xff] }
  0x1a   :  { %785 = vmatprep.subr.bf16.mxu0 %v835_v2  ;;  %815 = vmatprep.subr.bf16.mxu1 %v835_v2  ;;  %v1080_v21 = vld [vmem:[#allocation2 + $0x68] sm:$0xff]  ;;  %v51_v24 = vpack.c.bf16 %v38_v19, %v1076_v18  ;;  %v40_v27 = vld [vmem:[#allocation2 + $0x38] sm:$0xff]  ;;  %v1091_v28 = vld [vmem:[#allocation2 + $0x70] sm:$0xff] }
  0x1b   :  { %805 = vmatprep.mubr.bf16.mxu1 %v53_v9  ;;  %v55_v25 = vpack.c.bf16 %v1080_v21, %v1078_v20  ;;  %v48_v29 = vld [vmem:[#allocation2 + $0x78] sm:$0xff]  ;;  %v52_v30 = vpack.c.bf16 %v40_v27, %v1089_v26  ;;  %v1098_v32 = vld [vmem:[%s1325_s2] ss:$0 sm:$0xff] }
  0x1c   :  { %v56_v31 = vpack.c.bf16 %v48_v29, %v1091_v28  ;;  %v1113_v59 = vld [vmem:[%s1326_s3] ss:$0 sm:$0xff]  ;;  %s991_s3 = smov [#allocation5]  }
  0x1d   :  { %786 = vmatpush3.bf16.msra.mxu0 %v835_v2  ;;  %823 = vmatpush3.bf16.msra.mxu1 %v835_v2  ;;  %s743_s20 = sshll.u32 %s991_s3, 4  ;;  %s744_s20 = int_to_ptr.vmem [resolvable:$true] %s743_s20 }
  0x1e   :  { %787 = vmatprep.subr.bf16.mxu0 %v836_v3  ;;  %816 = vmatprep.subr.bf16.mxu1 %v836_v3  ;;  %s962_s21 = scalar_lea.vmem %s744_s20, 256  ;;  %p967_p9 = scmp.lt.s32.totalorder %s744_s20, %s744_s20 }
  0x1f   :  { %p963_p8 = scmp.ne.s32.totalorder %s744_s20, %s962_s21  ;;  %p968_p10 = scmp.lt.s32.totalorder %s962_s21, %s962_s21 }
  0x21   :  { %788 = vmatpush3.bf16.msra.mxu0 %v836_v3  ;;  %824 = vmatpush3.bf16.msra.mxu1 %v836_v3  ;;  %p969_p11 = por %p968_p10, %p967_p9 }
  0x22   :  { %789 = vmatprep.subr.bf16.mxu0 %v837_v10  ;;  %817 = vmatprep.subr.bf16.mxu1 %v837_v10 }
  0x23   :  { %p970_p12 = pnand %p969_p11, %p963_p8 }
  0x25   :  { %790 = vmatpush3.bf16.msra.mxu0 %v837_v10  ;;  %825 = vmatpush3.bf16.msra.mxu1 %v837_v10 }
  0x26   :  { %791 = vmatprep.subr.bf16.mxu0 %v838_v11  ;;  %818 = vmatprep.subr.bf16.mxu1 %v838_v11 }
  0x29   :  { %792 = vmatpush3.bf16.msra.mxu0 %v838_v11  ;;  %826 = vmatpush3.bf16.msra.mxu1 %v838_v11 }
  0x2a   :  { %793 = vmatprep.subr.bf16.mxu0 %v839_v12  ;;  %819 = vmatprep.subr.bf16.mxu1 %v839_v12 }
  0x2d   :  { %794 = vmatpush3.bf16.msra.mxu0 %v839_v12  ;;  %827 = vmatpush3.bf16.msra.mxu1 %v839_v12 }
  0x2e   :  { %795 = vmatprep.subr.bf16.mxu0 %v840_v13  ;;  %820 = vmatprep.subr.bf16.mxu1 %v840_v13 }
  0x31   :  { %796 = vmatpush3.bf16.msra.mxu0 %v840_v13  ;;  %828 = vmatpush3.bf16.msra.mxu1 %v840_v13 }
  0x34   :  { %798 = vmatmul.mubr.bf16.vlgmr.msra.gmra.mrb[0].mxu0 %v50_v22  ;;  %806 = vmatmul.mubr.bf16.vlgmr.msra.gmra.mrb[0].mxu1 %v54_v23 }
  0x35   :  { %801 = vmatprep.mubr.bf16.mxu0 %v51_v24  ;;  %809 = vmatprep.mubr.bf16.mxu1 %v55_v25 }
  0x3c   :  { %802 = vmatmul.mubr.bf16.gmra.mrb[4].mxu0 %v52_v30  ;;  %810 = vmatmul.mubr.bf16.gmra.mrb[4].mxu1 %v56_v31 }
 0x107   :  { %v799_v33 = vpop.f32.mrb[0].mxu0  ;;  %v807_v34 = vpop.f32.mrb[0].mxu1 }
 0x108   :  { %v171_v35 = vadd.f32 %v799_v33, %v1098_v32  ;;  %v203_v36 = vadd.f32 %v807_v34, %v1098_v32  ;;  %v162_v37 = vpop.f32.mrb[1].mxu0  ;;  %v194_v38 = vpop.f32.mrb[1].mxu1 }
 0x109   :  { %v163_v39 = vadd.f32 %v1098_v32, %v162_v37  ;;  %v195_v40 = vadd.f32 %v1098_v32, %v194_v38  ;;  %v800_v41 = vpop.f32.mrb[2].mxu0  ;;  %v808_v42 = vpop.f32.mrb[2].mxu1 }
 0x10a   :  { %841 = vtanh.f32 %v171_v35  ;;  %v174_v43 = vadd.f32 %v800_v41, %v1098_v32  ;;  %v165_v44 = vpop.f32.mrb[3].mxu0  ;;  %v197_v45 = vpop.f32.mrb[3].mxu1  ;;  %v206_v46 = vadd.f32 %v808_v42, %v1098_v32 }
 0x10b   :  { %843 = vtanh.f32 %v203_v36  ;;  %v166_v47 = vadd.f32 %v1098_v32, %v165_v44  ;;  %v198_v48 = vadd.f32 %v1098_v32, %v197_v45 }
 0x10c   :  { %845 = vtanh.f32 %v163_v39 }
 0x10d   :  { %847 = vtanh.f32 %v195_v40 }
 0x10e   :  { %849 = vtanh.f32 %v174_v43 }
 0x10f   :  { %851 = vtanh.f32 %v206_v46  ;;  %v803_v49 = vpop.f32.mrb[4].mxu0  ;;  %v811_v50 = vpop.f32.mrb[4].mxu1 }
 0x110   :  { %v187_v51 = vadd.f32 %v803_v49, %v1098_v32  ;;  %v178_v52 = vpop.f32.mrb[5].mxu0  ;;  %v210_v53 = vpop.f32.mrb[5].mxu1  ;;  %v219_v54 = vadd.f32 %v811_v50, %v1098_v32  ;;  %853 = vtanh.f32 %v166_v47 }
 0x111   :  { %v804_v55 = vpop.f32.mrb[6].mxu0  ;;  %v812_v56 = vpop.f32.mrb[6].mxu1  ;;  %855 = vtanh.f32 %v198_v48  ;;  %v179_v0 = vadd.f32 %v1098_v32, %v178_v52  ;;  %v211_v3 = vadd.f32 %v1098_v32, %v210_v53 }
 0x112   :  { %v181_v57 = vpop.f32.mrb[7].mxu0  ;;  %v213_v58 = vpop.f32.mrb[7].mxu1  ;;  %857 = vtanh.f32 %v187_v51  ;;  %v190_v33 = vadd.f32 %v804_v55, %v1098_v32  ;;  %v222_v35 = vadd.f32 %v812_v56, %v1098_v32 }
 0x113   :  { %859 = vtanh.f32 %v219_v54  ;;  %v182_v19 = vadd.f32 %v1098_v32, %v181_v57  ;;  %v214_v22 = vadd.f32 %v1098_v32, %v213_v58 }
 0x114   :  { %v842_v60 = vpop.eup %841  ;;  %861 = vtanh.f32 %v179_v0 }
 0x115   :  { %v844_v61 = vpop.eup %843  ;;  %v250_v62 = vmul.f32 %v842_v60, %v1113_v59  ;;  %863 = vtanh.f32 %v211_v3 }
 0x116   :  { %v846_v63 = vpop.eup %845  ;;  %v258_v1 = vmul.f32 %v844_v61, %v1113_v59  ;;  %865 = vtanh.f32 %v182_v19 }
 0x117   :  { %v848_v2 = vpop.eup %847  ;;  %v271_v7 = vsel %vm264_vm0, %v250_v62, 0.0  ;;  %v248_v9 = vmul.f32 %v846_v63, %v1113_v59  ;;  %867 = vtanh.f32 %v214_v22 }
 0x118   :  { %v850_v10 = vpop.eup %849  ;;  %v295_v11 = vsel %vm264_vm0, %v258_v1, 0.0  ;;  %272 = vadd.xlane.f32.xlu0 %v271_v7  ;;  %v256_v12 = vmul.f32 %v848_v2, %v1113_v59  ;;  %869 = vtanh.f32 %v190_v33 }
 0x119   :  { %v852_v13 = vpop.eup %851  ;;  %296 = vadd.xlane.f32.xlu1 %v295_v11  ;;  %v265_v23 = vsel %vm264_vm0, %v248_v9, 0.0  ;;  %v251_v24 = vmul.f32 %v850_v10, %v1113_v59  ;;  %871 = vtanh.f32 %v222_v35 }
 0x11a   :  { %v854_v25 = vpop.eup %853  ;;  %v289_v27 = vsel %vm264_vm0, %v256_v12, 0.0  ;;  %v259_v29 = vmul.f32 %v852_v13, %v1113_v59 }
 0x11b   :  { %v856_v30 = vpop.eup %855  ;;  %v274_v36 = vsel %vm264_vm0, %v251_v24, 0.0  ;;  %v249_v37 = vmul.f32 %v854_v25, %v1113_v59 }
 0x11c   :  { %266 = vadd.xlane.f32.xlu0 %v265_v23  ;;  %v858_v31 = vpop.eup %857  ;;  %v298_v38 = vsel %vm264_vm0, %v259_v29, 0.0  ;;  %v257_v39 = vmul.f32 %v856_v30, %v1113_v59 }
 0x11d   :  { %290 = vadd.xlane.f32.xlu1 %v289_v27  ;;  %v860_v34 = vpop.eup %859  ;;  %v254_v40 = vmul.f32 %v858_v31, %v1113_v59  ;;  %v268_v42 = vsel %vm264_vm0, %v249_v37, 0.0 }
 0x11e   :  { %v262_v41 = vmul.f32 %v860_v34, %v1113_v59  ;;  %v862_v32 = vpop.eup %861  ;;  %v292_v43 = vsel %vm264_vm0, %v257_v39, 0.0 }
 0x11f   :  { %v864_v44 = vpop.eup %863  ;;  %v283_v45 = vsel %vm264_vm0, %v254_v40, 0.0  ;;  %v252_v47 = vmul.f32 %v862_v32, %v1113_v59 }
 0x120   :  { %275 = vadd.xlane.f32.xlu0 %v274_v36  ;;  %v307_v46 = vsel %vm264_vm0, %v262_v41, 0.0  ;;  %v866_v48 = vpop.eup %865  ;;  %v260_v49 = vmul.f32 %v864_v44, %v1113_v59 }
 0x121   :  { %299 = vadd.xlane.f32.xlu1 %v298_v38  ;;  %v868_v50 = vpop.eup %867  ;;  %v277_v51 = vsel %vm264_vm0, %v252_v47, 0.0  ;;  %v253_v52 = vmul.f32 %v866_v48, %v1113_v59 }
 0x122   :  { %v870_v53 = vpop.eup %869  ;;  %v301_v54 = vsel %vm264_vm0, %v260_v49, 0.0  ;;  %v261_v55 = vmul.f32 %v868_v50, %v1113_v59 }
 0x123   :  { %v872_v56 = vpop.eup %871  ;;  %v280_v57 = vsel %vm264_vm0, %v253_v52, 0.0  ;;  %v255_v58 = vmul.f32 %v870_v53, %v1113_v59 }
 0x124   :  { %269 = vadd.xlane.f32.xlu0 %v268_v42  ;;  %v304_v60 = vsel %vm264_vm0, %v261_v55, 0.0  ;;  %v263_v61 = vmul.f32 %v872_v56, %v1113_v59 }
 0x125   :  { %293 = vadd.xlane.f32.xlu1 %v292_v43  ;;  %v286_v62 = vsel %vm264_vm0, %v255_v58, 0.0 }
 0x126   :  { %v310_v63 = vsel %vm264_vm0, %v263_v61, 0.0 }
 0x128   :  { %284 = vadd.xlane.f32.xlu0 %v283_v45 }
 0x129   :  { %308 = vadd.xlane.f32.xlu1 %v307_v46 }
 0x12c   :  { %278 = vadd.xlane.f32.xlu0 %v277_v51 }
 0x12d   :  { %302 = vadd.xlane.f32.xlu1 %v301_v54 }
 0x130   :  { %281 = vadd.xlane.f32.xlu0 %v280_v57 }
 0x131   :  { %305 = vadd.xlane.f32.xlu1 %v304_v60 }
 0x134   :  { %287 = vadd.xlane.f32.xlu0 %v286_v62 }
 0x135   :  { %311 = vadd.xlane.f32.xlu1 %v310_v63 }
 0x1a5   :  { %v273_v0 = vpop.xlane.xlu0 %272 }
 0x1a6   :  { %v297_v1 = vpop.xlane.xlu1 %296  ;;  %v325_v2 = vrot.slane %v273_v0, 4 }
 0x1a7   :  { %v373_v3 = vrot.slane %v297_v1, 4 }
 0x1a8   :  { %v326_v7 = vmax.f32 %v273_v0, %v325_v2 }
 0x1a9   :  { %v374_v9 = vmax.f32 %v297_v1, %v373_v3  ;;  %v267_v10 = vpop.xlane.xlu0 %266 }
 0x1aa   :  { %v327_v11 = vrot.slane %v326_v7, 2  ;;  %v291_v12 = vpop.xlane.xlu1 %290  ;;  %v313_v13 = vrot.slane %v267_v10, 4 }
 0x1ab   :  { %v375_v19 = vrot.slane %v374_v9, 2  ;;  %v361_v22 = vrot.slane %v291_v12, 4 }
 0x1ac   :  { %v328_v59 = vmax.f32 %v326_v7, %v327_v11  ;;  %v314_v23 = vmax.f32 %v267_v10, %v313_v13 }
 0x1ad   :  { %v376_v24 = vmax.f32 %v374_v9, %v375_v19  ;;  %v362_v25 = vmax.f32 %v291_v12, %v361_v22  ;;  %v276_v27 = vpop.xlane.xlu0 %275 }
 0x1ae   :  { %v329_v29 = vrot.slane %v328_v59, 1  ;;  %v315_v30 = vrot.slane %v314_v23, 2  ;;  %v300_v31 = vpop.xlane.xlu1 %299  ;;  %v331_v33 = vrot.slane %v276_v27, 4 }
 0x1af   :  { %v377_v34 = vrot.slane %v376_v24, 1  ;;  %v363_v35 = vrot.slane %v362_v25, 2  ;;  %v379_v36 = vrot.slane %v300_v31, 4 }
 0x1b0   :  { %v330_v37 = vmax.f32 %v328_v59, %v329_v29  ;;  %v316_v38 = vmax.f32 %v314_v23, %v315_v30  ;;  %v332_v39 = vmax.f32 %v276_v27, %v331_v33 }
 0x1b1   :  { %v378_v40 = vmax.f32 %v376_v24, %v377_v34  ;;  %v364_v41 = vmax.f32 %v362_v25, %v363_v35  ;;  %v380_v42 = vmax.f32 %v300_v31, %v379_v36  ;;  %v1153_v32 = vpop.xlane.xlu0 %269 }
 0x1b2   :  { %v411_v43 = vsub.f32 %v273_v0, %v330_v37  ;;  %v317_v44 = vrot.slane %v316_v38, 1  ;;  %v333_v45 = vrot.slane %v332_v39, 2  ;;  %v1155_v46 = vpop.xlane.xlu1 %293  ;;  %v319_v47 = vrot.slane %v1153_v32, 4 }
 0x1b3   :  { %v419_v48 = vsub.f32 %v297_v1, %v378_v40  ;;  %v365_v49 = vrot.slane %v364_v41, 1  ;;  %v381_v50 = vrot.slane %v380_v42, 2  ;;  %v367_v51 = vrot.slane %v1155_v46, 4 }
 0x1b4   :  { %v429_v52 = vmul.f32 1.442695, %v411_v43  ;;  %v318_v53 = vmax.f32 %v316_v38, %v317_v44  ;;  %v334_v54 = vmax.f32 %v332_v39, %v333_v45  ;;  %v320_v55 = vmax.f32 %v1153_v32, %v319_v47 }
 0x1b5   :  { %v445_v56 = vmul.f32 1.442695, %v419_v48  ;;  %v366_v57 = vmax.f32 %v364_v41, %v365_v49  ;;  %v382_v58 = vmax.f32 %v380_v42, %v381_v50  ;;  %v368_v60 = vmax.f32 %v1155_v46, %v367_v51  ;;  %v1161_v61 = vpop.xlane.xlu0 %284 }
 0x1b6   :  { %873 = vpow2.f32 %v429_v52  ;;  %v409_v62 = vsub.f32 %v267_v10, %v318_v53  ;;  %v335_v63 = vrot.slane %v334_v54, 1  ;;  %v321_v0 = vrot.slane %v320_v55, 2  ;;  %v1163_v1 = vpop.xlane.xlu1 %308 }
 0x1b7   :  { %875 = vpow2.f32 %v445_v56  ;;  %v417_v2 = vsub.f32 %v291_v12, %v366_v57  ;;  %v383_v3 = vrot.slane %v382_v58, 1  ;;  %v369_v7 = vrot.slane %v368_v60, 2 }
 0x1b8   :  { %v425_v9 = vmul.f32 1.442695, %v409_v62  ;;  %v336_v11 = vmax.f32 %v334_v54, %v335_v63  ;;  %v322_v13 = vmax.f32 %v320_v55, %v321_v0  ;;  %v397_v19 = vrot.slane %v1163_v1, 4 }
 0x1b9   :  { %v441_v22 = vmul.f32 1.442695, %v417_v2  ;;  %v384_v59 = vmax.f32 %v382_v58, %v383_v3  ;;  %v370_v23 = vmax.f32 %v368_v60, %v369_v7  ;;  %v349_v24 = vrot.slane %v1161_v61, 4  ;;  %v1170_v12 = vpop.xlane.xlu0 %278 }
 0x1ba   :  { %877 = vpow2.f32 %v425_v9  ;;  %v412_v10 = vsub.f32 %v276_v27, %v336_v11  ;;  %v323_v25 = vrot.slane %v322_v13, 1  ;;  %v398_v29 = vmax.f32 %v1163_v1, %v397_v19  ;;  %v1168_v30 = vpop.xlane.xlu1 %302 }
 0x1bb   :  { %879 = vpow2.f32 %v441_v22  ;;  %v420_v33 = vsub.f32 %v300_v31, %v384_v59  ;;  %v371_v34 = vrot.slane %v370_v23, 1  ;;  %v350_v35 = vmax.f32 %v1161_v61, %v349_v24 }
 0x1bc   :  { %v431_v36 = vmul.f32 1.442695, %v412_v10  ;;  %v324_v37 = vmax.f32 %v322_v13, %v323_v25  ;;  %v399_v38 = vrot.slane %v398_v29, 2  ;;  %v385_v39 = vrot.slane %v1168_v30, 4 }
 0x1bd   :  { %v447_v40 = vmul.f32 1.442695, %v420_v33  ;;  %v372_v41 = vmax.f32 %v370_v23, %v371_v34  ;;  %v351_v27 = vrot.slane %v350_v35, 2  ;;  %v337_v42 = vrot.slane %v1170_v12, 4 }
 0x1be   :  { %881 = vpow2.f32 %v431_v36  ;;  %v410_v43 = vsub.f32 %v1153_v32, %v324_v37  ;;  %v400_v44 = vmax.f32 %v398_v29, %v399_v38  ;;  %v386_v45 = vmax.f32 %v1168_v30, %v385_v39  ;;  %v1194_v59 = vpop.xlane.xlu1 %305 }
 0x1bf   :  { %883 = vpow2.f32 %v447_v40  ;;  %v418_v31 = vsub.f32 %v1155_v46, %v372_v41  ;;  %v352_v47 = vmax.f32 %v350_v35, %v351_v27  ;;  %v338_v48 = vmax.f32 %v1170_v12, %v337_v42 }
 0x1c0   :  { %v1179_v49 = vpop.eup %873  ;;  %v427_v50 = vmul.f32 1.442695, %v410_v43  ;;  %v401_v51 = vrot.slane %v400_v44, 1  ;;  %v387_v52 = vrot.slane %v386_v45, 2  ;;  %v391_v36 = vrot.slane %v1194_v59, 4 }
 0x1c1   :  { %v1181_v53 = vpop.eup %875  ;;  %v469_v54 = vrot.slane %v1179_v49, 4  ;;  %v443_v55 = vmul.f32 1.442695, %v418_v31  ;;  %v353_v32 = vrot.slane %v352_v47, 1  ;;  %v339_v56 = vrot.slane %v338_v48, 2 }
 0x1c2   :  { %v517_v57 = vrot.slane %v1181_v53, 4  ;;  %885 = vpow2.f32 %v427_v50  ;;  %v402_v58 = vmax.f32 %v400_v44, %v401_v51  ;;  %v388_v46 = vmax.f32 %v386_v45, %v387_v52 }
 0x1c3   :  { %v470_v60 = vadd.f32 %v1179_v49, %v469_v54  ;;  %887 = vpow2.f32 %v443_v55  ;;  %v354_v62 = vmax.f32 %v352_v47, %v353_v32  ;;  %v340_v63 = vmax.f32 %v338_v48, %v339_v56  ;;  %v1216_v54 = vpop.xlane.xlu0 %281 }
 0x1c4   :  { %v1186_v0 = vpop.eup %877  ;;  %v518_v2 = vadd.f32 %v1181_v53, %v517_v57  ;;  %v423_v3 = vsub.f32 %v1163_v1, %v402_v58  ;;  %v389_v7 = vrot.slane %v388_v46, 1 }
 0x1c5   :  { %v1190_v9 = vpop.eup %879  ;;  %v471_v11 = vrot.slane %v470_v60, 2  ;;  %v457_v13 = vrot.slane %v1186_v0, 4  ;;  %v415_v19 = vsub.f32 %v1161_v61, %v354_v62  ;;  %v341_v22 = vrot.slane %v340_v63, 1 }
 0x1c6   :  { %v519_v23 = vrot.slane %v518_v2, 2  ;;  %v505_v24 = vrot.slane %v1190_v9, 4  ;;  %v453_v10 = vmul.f32 1.442695, %v423_v3  ;;  %v390_v25 = vmax.f32 %v388_v46, %v389_v7 }
 0x1c7   :  { %v458_v29 = vadd.f32 %v1186_v0, %v457_v13  ;;  %v437_v33 = vmul.f32 1.442695, %v415_v19  ;;  %v342_v1 = vmax.f32 %v340_v63, %v341_v22  ;;  %v472_v37 = vadd.f32 %v471_v11, %v470_v60 }
 0x1c8   :  { %v1198_v34 = vpop.eup %881  ;;  %889 = vpow2.f32 %v453_v10  ;;  %v421_v35 = vsub.f32 %v1168_v30, %v390_v25  ;;  %v506_v38 = vadd.f32 %v1190_v9, %v505_v24  ;;  %v520_v39 = vadd.f32 %v519_v23, %v518_v2 }
 0x1c9   :  { %v1202_v61 = vpop.eup %883  ;;  %891 = vpow2.f32 %v437_v33  ;;  %v475_v40 = vrot.slane %v1198_v34, 4  ;;  %v459_v27 = vrot.slane %v458_v29, 2  ;;  %v413_v43 = vsub.f32 %v1170_v12, %v342_v1 }
 0x1ca   :  { %v449_v41 = vmul.f32 1.442695, %v421_v35  ;;  %v523_v42 = vrot.slane %v1202_v61, 4  ;;  %v392_v30 = vmax.f32 %v1194_v59, %v391_v36  ;;  %v473_v31 = vrot.slane %v472_v37, 1  ;;  %v1228_v35 = vpop.xlane.xlu1 %311 }
 0x1cb   :  { %v507_v47 = vrot.slane %v506_v38, 2  ;;  %v521_v50 = vrot.slane %v520_v39, 1  ;;  %v476_v51 = vadd.f32 %v1198_v34, %v475_v40  ;;  %v460_v55 = vadd.f32 %v459_v27, %v458_v29 }
 0x1cc   :  { %v1208_v44 = vpop.eup %885  ;;  %893 = vpow2.f32 %v449_v41  ;;  %v524_v12 = vadd.f32 %v1202_v61, %v523_v42  ;;  %v433_v56 = vmul.f32 1.442695, %v413_v43  ;;  %v393_v58 = vrot.slane %v392_v30, 2 }
 0x1cd   :  { %v1211_v45 = vpop.eup %887  ;;  %v463_v48 = vrot.slane %v1208_v44, 4  ;;  %v474_v46 = vadd.f32 %v473_v31, %v472_v37  ;;  %v508_v60 = vadd.f32 %v507_v47, %v506_v38  ;;  %v343_v63 = vrot.slane %v1216_v54, 4 }
 0x1ce   :  { %v511_v52 = vrot.slane %v1211_v45, 4  ;;  %v522_v3 = vadd.f32 %v521_v50, %v520_v39  ;;  %v477_v7 = vrot.slane %v476_v51, 2  ;;  %v394_v13 = vmax.f32 %v392_v30, %v393_v58 }
 0x1cf   :  { %v464_v32 = vadd.f32 %v1208_v44, %v463_v48  ;;  %v461_v22 = vrot.slane %v460_v55, 1  ;;  %v525_v23 = vrot.slane %v524_v12, 2  ;;  %895 = vpow2.f32 %v433_v56  ;;  %v1236_v48 = vpop.xlane.xlu0 %287 }
 0x1d0   :  { %v512_v57 = vadd.f32 %v1211_v45, %v511_v52  ;;  %v395_v25 = vrot.slane %v394_v13, 1  ;;  %897 = vrcp.f32 %v474_v46  ;;  %v509_v29 = vrot.slane %v508_v60, 1 }
 0x1d1   :  { %v465_v62 = vrot.slane %v464_v32, 2  ;;  %v344_v1 = vmax.f32 %v1216_v54, %v343_v63  ;;  %899 = vrcp.f32 %v522_v3  ;;  %v478_v37 = vadd.f32 %v477_v7, %v476_v51 }
 0x1d2   :  { %v1222_v2 = vpop.eup %889  ;;  %v513_v11 = vrot.slane %v512_v57, 2  ;;  %v396_v39 = vmax.f32 %v394_v13, %v395_v25  ;;  %v462_v40 = vadd.f32 %v461_v22, %v460_v55  ;;  %v526_v41 = vadd.f32 %v525_v23, %v524_v12 }
 0x1d3   :  { %v1224_v19 = vpop.eup %891  ;;  %v466_v10 = vadd.f32 %v465_v62, %v464_v32  ;;  %v541_v38 = vrot.slane %v1222_v2, 4  ;;  %v345_v42 = vrot.slane %v344_v1, 2  ;;  %v403_v47 = vrot.slane %v1228_v35, 4 }
 0x1d4   :  { %v514_v24 = vadd.f32 %v513_v11, %v512_v57  ;;  %v493_v33 = vrot.slane %v1224_v19, 4  ;;  %v422_v31 = vsub.f32 %v1194_v59, %v396_v39  ;;  %v510_v50 = vadd.f32 %v509_v29, %v508_v60 }
 0x1d5   :  { %v467_v30 = vrot.slane %v466_v10, 1  ;;  %v346_v32 = vmax.f32 %v344_v1, %v345_v42  ;;  %v479_v56 = vrot.slane %v478_v37, 1  ;;  %v542_v55 = vadd.f32 %v1222_v2, %v541_v38 }
 0x1d6   :  { %v1230_v36 = vpop.eup %893  ;;  %v515_v43 = vrot.slane %v514_v24, 1  ;;  %v494_v52 = vadd.f32 %v1224_v19, %v493_v33  ;;  %v451_v12 = vmul.f32 1.442695, %v422_v31  ;;  %v404_v57 = vmax.f32 %v1228_v35, %v403_v47 }
 0x1d7   :  { %v529_v27 = vrot.slane %v1230_v36, 4  ;;  %v527_v58 = vrot.slane %v526_v41, 1  ;;  %v347_v62 = vrot.slane %v346_v32, 1  ;;  %v355_v59 = vrot.slane %v1236_v48, 4 }
 0x1d8   :  { %v516_v63 = vadd.f32 %v515_v43, %v514_v24  ;;  %v468_v3 = vadd.f32 %v467_v30, %v466_v10  ;;  %901 = vpow2.f32 %v451_v12  ;;  %v405_v60 = vrot.slane %v404_v57, 2 }
 0x1d9   :  { %v530_v51 = vadd.f32 %v1230_v36, %v529_v27  ;;  %v1243_v7 = vpop.eup %895  ;;  %v495_v11 = vrot.slane %v494_v52, 2  ;;  %v348_v22 = vmax.f32 %v346_v32, %v347_v62  ;;  %v356_v23 = vmax.f32 %v1236_v48, %v355_v59 }
 0x1da   :  { %v480_v25 = vadd.f32 %v479_v56, %v478_v37  ;;  %v543_v29 = vrot.slane %v542_v55, 2  ;;  %v481_v33 = vrot.slane %v1243_v7, 4  ;;  %v406_v1 = vmax.f32 %v404_v57, %v405_v60  ;;  %v898_v38 = vpop.eup %897 }
 0x1db   :  { %v531_v46 = vrot.slane %v530_v51, 2  ;;  %903 = vrcp.f32 %v462_v40  ;;  %v414_v24 = vsub.f32 %v1216_v54, %v348_v22  ;;  %v357_v10 = vrot.slane %v356_v23, 2  ;;  %v900_v27 = vpop.eup %899 }
 0x1dc   :  { %v528_v42 = vadd.f32 %v527_v58, %v526_v41  ;;  %905 = vrcp.f32 %v468_v3  ;;  %v482_v43 = vadd.f32 %v1243_v7, %v481_v33  ;;  %v407_v30 = vrot.slane %v406_v1, 1 }
 0x1dd   :  { %v532_v13 = vadd.f32 %v531_v46, %v530_v51  ;;  %907 = vrcp.f32 %v516_v63  ;;  %v496_v31 = vadd.f32 %v495_v11, %v494_v52  ;;  %v435_v47 = vmul.f32 1.442695, %v414_v24 }
 0x1de   :  { %v358_v37 = vmax.f32 %v356_v23, %v357_v10  ;;  %909 = vrcp.f32 %v480_v25  ;;  %v544_v51 = vadd.f32 %v543_v29, %v542_v55  ;;  %v483_v32 = vrot.slane %v482_v43, 2 }
 0x1df   :  { %v533_v39 = vrot.slane %v532_v13, 1  ;;  %v408_v56 = vmax.f32 %v406_v1, %v407_v30  ;;  %911 = vrcp.f32 %v510_v50  ;;  %v497_v58 = vrot.slane %v496_v31, 1 }
 0x1e0   :  { %v359_v12 = vrot.slane %v358_v37, 1  ;;  %v484_v57 = vadd.f32 %v483_v32, %v482_v43  ;;  %913 = vpow2.f32 %v435_v47  ;;  %v545_v59 = vrot.slane %v544_v51, 1 }
 0x1e1   :  { %v534_v40 = vadd.f32 %v533_v39, %v532_v13  ;;  %v424_v54 = vsub.f32 %v1228_v35, %v408_v56  ;;  %915 = vrcp.f32 %v528_v42  ;;  %v498_v35 = vadd.f32 %v497_v58, %v496_v31 }
 0x1e2   :  { %v360_v41 = vmax.f32 %v358_v37, %v359_v12  ;;  %v1250_v46 = vpop.eup %901  ;;  %v485_v62 = vrot.slane %v484_v57, 1  ;;  %v546_v22 = vadd.f32 %v545_v59, %v544_v51  ;;  %v571_v42 = vmul.f32 %v898_v38, %v1179_v49 }
 0x1e3   :  { %v455_v52 = vmul.f32 1.442695, %v424_v54  ;;  %917 = vrcp.f32 %v534_v40  ;;  %v535_v55 = vrot.slane %v1250_v46, 4  ;;  %v579_v49 = vmul.f32 %v900_v27, %v1181_v53 }
 0x1e4   :  { %v416_v63 = vsub.f32 %v1236_v48, %v360_v41  ;;  %v486_v50 = vadd.f32 %v485_v62, %v484_v57  ;;  %v587_v40 = vmul.f32 %v571_v42, %v1068_v14 }
 0x1e5   :  { %919 = vpow2.f32 %v455_v52  ;;  %v904_v3 = vpop.eup %903  ;;  %v536_v60 = vadd.f32 %v1250_v46, %v535_v55  ;;  %v595_v27 = vmul.f32 %v579_v49, %v1072_v16 }
 0x1e6   :  { %v439_v11 = vmul.f32 1.442695, %v416_v63  ;;  %v906_v13 = vpop.eup %905  ;;  %921 = vrcp.f32 %v486_v50  ;;  %v569_v33 = vmul.f32 %v904_v3, %v1186_v0  ;;  %v613_v62 = vrot.slane %v587_v40, 4 }
 0x1e7   :  { %v908_v23 = vpop.eup %907  ;;  %v537_v25 = vrot.slane %v536_v60, 2  ;;  %v570_v39 = vmul.f32 %v906_v13, %v1208_v44 }
 0x1e8   :  { %923 = vpow2.f32 %v439_v11  ;;  %v910_v29 = vpop.eup %909  ;;  %v578_v10 = vmul.f32 %v908_v23, %v1211_v45  ;;  %v585_v37 = vmul.f32 %v569_v33, %v1044_v4 }
 0x1e9   :  { %v912_v1 = vpop.eup %911  ;;  %v538_v48 = vadd.f32 %v537_v25, %v536_v60  ;;  %925 = vrcp.f32 %v498_v35  ;;  %v572_v47 = vmul.f32 %v910_v29, %v1198_v34  ;;  %v586_v56 = vmul.f32 %v570_v39, %v1046_v5 }
 0x1ea   :  { %v1257_v24 = vpop.eup %913  ;;  %927 = vrcp.f32 %v546_v22  ;;  %v577_v0 = vmul.f32 %v912_v1, %v1190_v9  ;;  %v594_v34 = vmul.f32 %v578_v10, %v1052_v8  ;;  %v601_v5 = vrot.slane %v585_v37, 4 }
 0x1eb   :  { %v916_v43 = vpop.eup %915  ;;  %v539_v30 = vrot.slane %v538_v48, 1  ;;  %v487_v31 = vrot.slane %v1257_v24, 4  ;;  %v588_v4 = vmul.f32 %v572_v47, %v1070_v15  ;;  %v607_v14 = vrot.slane %v586_v56, 4 }
 0x1ec   :  { %v580_v38 = vmul.f32 %v916_v43, %v1202_v61  ;;  %v593_v54 = vmul.f32 %v577_v0, %v1048_v6  ;;  %v655_v52 = vrot.slane %v594_v34, 4  ;;  %v602_v11 = vadd.f32 %v601_v5, %v585_v37 }
 0x1ed   :  { %v918_v44 = vpop.eup %917  ;;  %v488_v51 = vadd.f32 %v1257_v24, %v487_v31  ;;  %v540_v32 = vadd.f32 %v539_v30, %v538_v48  ;;  %v619_v63 = vrot.slane %v588_v4, 4  ;;  %v608_v16 = vadd.f32 %v607_v14, %v586_v56 }
 0x1ee   :  { %v581_v61 = vmul.f32 %v918_v44, %v1230_v36  ;;  %v596_v6 = vmul.f32 %v580_v38, %v1074_v17  ;;  %v649_v36 = vrot.slane %v593_v54, 4  ;;  %v614_v29 = vadd.f32 %v613_v62, %v587_v40 }
 0x1ef   :  { %v1267_v45 = vpop.eup %919  ;;  %v489_v12 = vrot.slane %v488_v51, 2  ;;  %929 = vrcp.f32 %v540_v32  ;;  %v656_v33 = vadd.f32 %v655_v52, %v594_v34  ;;  %v661_v39 = vrot.slane %v595_v27, 4 }
 0x1f0   :  { %v547_v9 = vrot.slane %v1267_v45, 4  ;;  %v922_v57 = vpop.eup %921  ;;  %v597_v22 = vmul.f32 %v581_v61, %v1078_v20  ;;  %v603_v10 = vrot.slane %v602_v11, 2  ;;  %v650_v42 = vadd.f32 %v649_v36, %v593_v54 }
 0x1f1   :  { %v490_v58 = vadd.f32 %v489_v12, %v488_v51  ;;  %v573_v60 = vmul.f32 %v922_v57, %v1243_v7  ;;  %v609_v31 = vrot.slane %v608_v16, 2  ;;  %v667_v20 = vrot.slane %v596_v6, 4 }
 0x1f2   :  { %v1276_v41 = vpop.eup %923  ;;  %v548_v53 = vadd.f32 %v1267_v45, %v547_v9  ;;  %v673_v47 = vrot.slane %v597_v22, 4  ;;  %v657_v44 = vrot.slane %v656_v33, 2  ;;  %v615_v51 = vrot.slane %v614_v29, 2 }
 0x1f3   :  { %v499_v8 = vrot.slane %v1276_v41, 4  ;;  %v926_v59 = vpop.eup %925  ;;  %v491_v15 = vrot.slane %v490_v58, 1  ;;  %v589_v7 = vmul.f32 %v573_v60, %v1076_v18  ;;  %v662_v32 = vadd.f32 %v661_v39, %v595_v27 }
 0x1f4   :  { %v549_v55 = vrot.slane %v548_v53, 2  ;;  %v928_v50 = vpop.eup %927  ;;  %v575_v25 = vmul.f32 %v926_v59, %v1224_v19  ;;  %v651_v38 = vrot.slane %v650_v42, 2  ;;  %v604_v40 = vadd.f32 %v603_v10, %v602_v11 }
 0x1f5   :  { %v500_v3 = vadd.f32 %v1276_v41, %v499_v8  ;;  %v492_v13 = vadd.f32 %v491_v15, %v490_v58  ;;  %v583_v17 = vmul.f32 %v928_v50, %v1222_v2  ;;  %v625_v49 = vrot.slane %v589_v7, 4 }
 0x1f6   :  { %v550_v35 = vadd.f32 %v549_v55, %v548_v53  ;;  %v591_v37 = vmul.f32 %v575_v25, %v1089_v26  ;;  %v620_v34 = vadd.f32 %v619_v63, %v588_v4  ;;  %v668_v12 = vadd.f32 %v667_v20, %v596_v6 }
 0x1f7   :  { %v501_v23 = vrot.slane %v500_v3, 2  ;;  %931 = vrcp.f32 %v492_v13  ;;  %v599_v2 = vmul.f32 %v583_v17, %v1091_v28  ;;  %v674_v9 = vadd.f32 %v673_v47, %v597_v22 }
 0x1f8   :  { %v551_v1 = vrot.slane %v550_v35, 1  ;;  %v658_v57 = vadd.f32 %v657_v44, %v656_v33  ;;  %v610_v54 = vadd.f32 %v609_v31, %v608_v16  ;;  %v637_v26 = vrot.slane %v591_v37, 4 }
 0x1f9   :  { %v502_v48 = vadd.f32 %v501_v23, %v500_v3  ;;  %v930_v43 = vpop.eup %929  ;;  %v663_v5 = vrot.slane %v662_v32, 2  ;;  %v685_v58 = vrot.slane %v599_v2, 4  ;;  %v616_v28 = vadd.f32 %v615_v51, %v614_v29  ;;  %v937_v3 = vld [vmem:[#allocation2 + $0x28] sm:$0xff] }
 0x1fa   :  { %v552_v30 = vadd.f32 %v551_v1, %v550_v35  ;;  %v582_v19 = vmul.f32 %v930_v43, %v1250_v46  ;;  %v626_v53 = vadd.f32 %v625_v49, %v589_v7  ;;  %v652_v61 = vadd.f32 %v651_v38, %v650_v42  ;;  %v938_v42 = vld [vmem:[#allocation2 + $0x78] sm:$0xff] }
 0x1fb   :  { %v503_v0 = vrot.slane %v502_v48, 1  ;;  %v621_v27 = vrot.slane %v620_v34, 2  ;;  %v669_v62 = vrot.slane %v668_v12, 2  ;;  %v675_v52 = vrot.slane %v674_v9, 2 }
 0x1fc   :  { %933 = vrcp.f32 %v552_v30  ;;  %v598_v18 = vmul.f32 %v582_v19, %v1080_v21  ;;  %v605_v21 = vrot.slane %v604_v40, 1  ;;  %v659_v59 = vrot.slane %v658_v57, 1 }
 0x1fd   :  { %v504_v56 = vadd.f32 %v503_v0, %v502_v48  ;;  %v611_v55 = vrot.slane %v610_v54, 1  ;;  %v638_v6 = vadd.f32 %v637_v26, %v591_v37  ;;  %v664_v63 = vadd.f32 %v663_v5, %v662_v32  ;;  %v939_v32 = vld [vmem:[#allocation2 + $0x38] sm:$0xff] }
 0x1fe   :  { %v679_v46 = vrot.slane %v598_v18, 4  ;;  %v686_v50 = vadd.f32 %v685_v58, %v599_v2  ;;  %v617_v11 = vrot.slane %v616_v28, 1  ;;  %v627_v36 = vrot.slane %v626_v53, 2 }
 0x1ff   :  { %935 = vrcp.f32 %v504_v56  ;;  %v653_v35 = vrot.slane %v652_v61, 1  ;;  %v606_v22 = vadd.f32 %v605_v21, %v604_v40  ;;  %v622_v16 = vadd.f32 %v621_v27, %v620_v34 }
 0x200   :  { %v680_v14 = vadd.f32 %v679_v46, %v598_v18  ;;  %v670_v23 = vadd.f32 %v669_v62, %v668_v12  ;;  %v676_v25 = vadd.f32 %v675_v52, %v674_v9  ;;  %v660_v33 = vadd.f32 %v659_v59, %v658_v57 }
 0x201   :  { %v932_v8 = vpop.eup %931  ;;  %v612_v17 = vadd.f32 %v611_v55, %v610_v54  ;;  %v639_v39 = vrot.slane %v638_v6, 2  ;;  %v665_v48 = vrot.slane %v664_v63, 1  ;;  %v687_v7 = vrot.slane %v686_v50, 2 }
 0x202   :  { %v574_v4 = vmul.f32 %v932_v8, %v1257_v24  ;;  %v681_v15 = vrot.slane %v680_v14, 2  ;;  %v628_v30 = vadd.f32 %v627_v36, %v626_v53  ;;  %v654_v20 = vadd.f32 %v653_v35, %v652_v61 }
 0x203   :  { %v618_v0 = vadd.f32 %v617_v11, %v616_v28  ;;  %v671_v19 = vrot.slane %v670_v23, 1  ;;  %v677_v37 = vrot.slane %v676_v25, 1  ;;  %v623_v18 = vrot.slane %v622_v16, 1 }
 0x204   :  { %v590_v60 = vmul.f32 %v937_v3, %v574_v4  ;;  %v682_v1 = vadd.f32 %v681_v15, %v680_v14  ;;  %v727_v51 = vsel %vm713_vm1, %v660_v33, %v654_v20  ;;  %v666_v49 = vadd.f32 %v665_v48, %v664_v63 }
 0x205   :  { %v688_v38 = vadd.f32 %v687_v7, %v686_v50  ;;  %v629_v40 = vrot.slane %v628_v30, 1  ;;  %v640_v12 = vadd.f32 %v639_v39, %v638_v6  ;;  %v678_v46 = vadd.f32 %v677_v37, %v676_v25 }
 0x206   :  { %v934_v13 = vpop.eup %933  ;;  %v631_v29 = vrot.slane %v590_v60, 4  ;;  %v683_v44 = vrot.slane %v682_v1, 1  ;;  %v728_v54 = vsel %vm715_vm2, %v666_v49, %v727_v51  ;;  %v672_v5 = vadd.f32 %v671_v19, %v670_v23 }
 0x207   :  { %v584_v24 = vmul.f32 %v934_v13, %v1267_v45  ;;  %v689_v61 = vrot.slane %v688_v38, 1  ;;  %v630_v14 = vadd.f32 %v629_v40, %v628_v30  ;;  %v624_v62 = vadd.f32 %v623_v18, %v622_v16 }
 0x208   :  { %v632_v31 = vadd.f32 %v631_v29, %v590_v60  ;;  %v684_v58 = vadd.f32 %v683_v44, %v682_v1  ;;  %v729_v27 = vsel %vm717_vm3, %v672_v5, %v728_v54  ;;  %v641_v15 = vrot.slane %v640_v12, 1 }
 0x209   :  { %v936_v10 = vpop.eup %935  ;;  %v600_v43 = vmul.f32 %v938_v42, %v584_v24  ;;  %v730_v59 = vsel %vm719_vm4, %v678_v46, %v729_v27  ;;  %v690_v50 = vadd.f32 %v689_v61, %v688_v38 }
 0x20a   :  { %v576_v47 = vmul.f32 %v936_v10, %v1276_v41  ;;  %v633_v45 = vrot.slane %v632_v31, 2  ;;  %v714_v41 = vsel %vm713_vm1, %v612_v17, %v606_v22  ;;  %v731_v6 = vsel %vm721_vm5, %v684_v58, %v730_v59 }
 0x20b   :  { %v691_v2 = vrot.slane %v600_v43, 4  ;;  %v716_v21 = vsel %vm715_vm2, %v618_v0, %v714_v41  ;;  %v732_v13 = vsel %vm723_vm6, %v690_v50, %v731_v6  ;;  %v642_v22 = vadd.f32 %v641_v15, %v640_v12 }
 0x20c   :  { %v592_v56 = vmul.f32 %v939_v32, %v576_v47  ;;  %v634_v34 = vadd.f32 %v633_v45, %v632_v31  ;;  %v718_v3 = vsel %vm717_vm3, %v624_v62, %v716_v21 }
 0x20d   :  { %v692_v9 = vadd.f32 %v691_v2, %v600_v43  ;;  %v720_v11 = vsel %vm719_vm4, %v630_v14, %v718_v3 }
 0x20e   :  { %v643_v57 = vrot.slane %v592_v56, 4  ;;  %v635_v26 = vrot.slane %v634_v34, 1 }
 0x20f   :  { %v693_v28 = vrot.slane %v692_v9, 2 }
 0x210   :  { %v644_v53 = vadd.f32 %v643_v57, %v592_v56  ;;  %v636_v52 = vadd.f32 %v635_v26, %v634_v34 }
 0x211   :  { %v694_v8 = vadd.f32 %v693_v28, %v692_v9 }
 0x212   :  { %v645_v4 = vrot.slane %v644_v53, 2  ;;  %v722_v35 = vsel %vm721_vm5, %v636_v52, %v720_v11 }
 0x213   :  { %v695_v55 = vrot.slane %v694_v8, 1  ;;  %v724_v25 = vsel %vm723_vm6, %v642_v22, %v722_v35 }
 0x214   :  { %v646_v63 = vadd.f32 %v645_v4, %v644_v53 }
 0x215   :  { %v696_v60 = vadd.f32 %v695_v55, %v694_v8 }
 0x216   :  { %v647_v36 = vrot.slane %v646_v63, 1 }
 0x217   :  { %v733_v16 = vsel %vm725_vm7, %v696_v60, %v732_v13 }
 0x218   :  { %v648_v23 = vadd.f32 %v647_v36, %v646_v63  ;;  %737 = vst [vmem:[#allocation5 + $0x8] sm:$0xff] %v733_v16 }
 0x21a   :  { %v726_v24 = vsel %vm725_vm7, %v648_v23, %v724_v25 }
 0x21b   :  { %736 = vst [vmem:[#allocation5] sm:$0xff] %v726_v24 }
 0x21c   :  { %973 = shalt.err (!%p970_p12)
}
 0x21d   :  { %s974_s24 = scalar_lea.hbm %s1327_s4, 256 }
 0x21e   :  { %p975_p13 = scmp.ne.s32.totalorder %s1327_s4, %s974_s24  ;;  %p978_p0 = scmp.lt.u32.totalorder %s974_s24, %s1327_s4 }
 0x220   :  { %p980_p1 = pnand %p978_p0, %p975_p13 }
 0x222   :  { %983 = shalt.err (!%p980_p1)
}
 0x223   :  { %749 = dma.vmem_to_hbm [thread:$0]  %s744_s20, 256, %s1327_s4, [#allocation4], %s989_s25, %s989_s25, %s990_s26  }
 0x224   :  { %986 = dma.done.wait [#allocation4], 256  }
 0x225   :  { %987 = vsyncadd [#allocation4], 4294967040 }
 0x226   :  { %753 = vsyncpa [#allocation3], 1 }
 0x227   :  { %754 = vsyncpa [#allocation4], 1 }

// kernel: tpu_custom_call.1
= control target key start
LH: loop header
LB: loop body
LE: loop exit
PB: predicated region body
PF: predicated region fallthrough
CT: control target
= control target key end

     0   :  { %9 = vsyncpa [#allocation3], 0  ;;  %s1323_s0 = inlined_call_operand.hbm [shape: f32[16,8,128], index: 0, kind: input, shape index: {}]   ;;  %s1324_s1 = inlined_call_operand.vmem [shape: bf16[128,32], index: 1, kind: input, shape index: {}]   ;;  %s1325_s2 = inlined_call_operand.vmem [shape: f32[1,32], index: 2, kind: input, shape index: {}]   ;;  %s1326_s3 = inlined_call_operand.vmem [shape: f32[1,32], index: 3, kind: input, shape index: {}]   ;;  %s1327_s4 = inlined_call_operand.hbm [shape: f32[16,128], index: 4, kind: output, shape index: {}]  }
   0x1   :  { %10 = vsyncpa [#allocation4], 0  ;;  %s988_s15 = smov [#allocation2]   ;;  %s940_s19 = scalar_lea.hbm %s1323_s0, 2048 }
   0x2   :  { %s16_s16 = sshll.u32 %s988_s15, 4  ;;  %p941_p0 = scmp.ne.s32.totalorder %s1323_s0, %s940_s19  ;;  %s17_s16 = int_to_ptr.vmem [resolvable:$true] %s16_s16 }
   0x3   :  { %p944_p1 = scmp.lt.u32.totalorder %s940_s19, %s1323_s0 }
   0x5   :  { %p946_p2 = pnand %p944_p1, %p941_p0 }
   0x7   :  { %949 = shalt.err (!%p946_p2)
}
   0x8   :  { %s950_s24 = scalar_lea.vmem %s17_s16, 2048  ;;  %p955_p4 = scmp.lt.s32.totalorder %s17_s16, %s17_s16 }
   0x9   :  { %p951_p3 = scmp.ne.s32.totalorder %s17_s16, %s950_s24  ;;  %p956_p5 = scmp.lt.s32.totalorder %s950_s24, %s950_s24 }
   0xb   :  { %p957_p6 = por %p956_p5, %p955_p4 }
   0xd   :  { %p958_p7 = pnand %p957_p6, %p951_p3 }
   0xf   :  { %961 = shalt.err (!%p958_p7)
}
  0x10   :  { %s989_s25 = smov 128   ;;  %s990_s26 = smov 8  }
  0x11   :  { %22 = dma.hbm_to_vmem [thread:$0]  %s1323_s0, 2048, %s17_s16, [#allocation3], %s989_s25, %s989_s25, %s990_s26  }
  0x12   :  { %984 = dma.done.wait [#allocation3], 2048  }
  0x13   :  { %985 = vsyncadd [#allocation3], 4294965248  ;;  %v833_v0 = vld [vmem:[%s1324_s1] sm:$0xff]   ;;  %v834_v1 = vld [vmem:[%s1324_s1 + $0x8] sm:$0xff]   ;;  %vm264_vm0 = vcmask 261120   ;;  %vm713_vm1 = vcmask 1041409  }
  0x14   :  { %781 = vmatprep.subr.bf16.mxu0 %v833_v0  ;;  %813 = vmatprep.subr.bf16.mxu1 %v833_v0  ;;  %v835_v2 = vld [vmem:[%s1324_s1 + $0x10] sm:$0xff]   ;;  %v836_v3 = vld [vmem:[%s1324_s1 + $0x18] sm:$0xff]   ;;  %v1044_v4 = vld [vmem:[#allocation2] sm:$0xff]  ;;  %vm715_vm2 = vcmask 1042434   ;;  %vm717_vm3 = vcmask 1043459   ;;  %vm719_vm4 = vcmask 1044484  }
  0x15   :  { %782 = vmatpush3.bf16.msra.mxu0 %v833_v0  ;;  %821 = vmatpush3.bf16.msra.mxu1 %v833_v0  ;;  %v1046_v5 = vld [vmem:[#allocation2 + $0x8] sm:$0xff]  ;;  %v1048_v6 = vld [vmem:[#allocation2 + $0x40] sm:$0xff]  ;;  %v839_v12 = vld [vmem:[%s1324_s1 + $0x30] sm:$0xff]   ;;  %vm721_vm5 = vcmask 1045509   ;;  %vm723_vm6 = vcmask 1046534   ;;  %vm725_vm7 = vcmask 1047559  }
  0x16   :  { %783 = vmatprep.subr.bf16.mxu0 %v834_v1  ;;  %814 = vmatprep.subr.bf16.mxu1 %v834_v1  ;;  %v49_v7 = vpack.c.bf16 %v1046_v5, %v1044_v4  ;;  %v1052_v8 = vld [vmem:[#allocation2 + $0x48] sm:$0xff]  ;;  %v837_v10 = vld [vmem:[%s1324_s1 + $0x20] sm:$0xff]   ;;  %v840_v13 = vld [vmem:[%s1324_s1 + $0x38] sm:$0xff]  }
  0x17   :  { %v53_v9 = vpack.c.bf16 %v1052_v8, %v1048_v6  ;;  %v838_v11 = vld [vmem:[%s1324_s1 + $0x28] sm:$0xff]   ;;  %v1068_v14 = vld [vmem:[#allocation2 + $0x10] sm:$0xff]  ;;  %v1070_v15 = vld [vmem:[#allocation2 + $0x18] sm:$0xff] }
  0x18   :  { %797 = vmatprep.mubr.bf16.mxu0 %v49_v7  ;;  %v1072_v16 = vld [vmem:[#allocation2 + $0x50] sm:$0xff]  ;;  %v1074_v17 = vld [vmem:[#allocation2 + $0x58] sm:$0xff]  ;;  %v1076_v18 = vld [vmem:[#allocation2 + $0x20] sm:$0xff]  ;;  %v50_v22 = vpack.c.bf16 %v1070_v15, %v1068_v14 }
  0x19   :  { %784 = vmatpush3.bf16.msra.mxu0 %v834_v1  ;;  %822 = vmatpush3.bf16.msra.mxu1 %v834_v1  ;;  %v38_v19 = vld [vmem:[#allocation2 + $0x28] sm:$0xff]  ;;  %v1078_v20 = vld [vmem:[#allocation2 + $0x60] sm:$0xff]  ;;  %v54_v23 = vpack.c.bf16 %v1074_v17, %v1072_v16  ;;  %v1089_v26 = vld [vmem:[#allocation2 + $0x30] sm:$0xff] }
  0x1a   :  { %785 = vmatprep.subr.bf16.mxu0 %v835_v2  ;;  %815 = vmatprep.subr.bf16.mxu1 %v835_v2  ;;  %v1080_v21 = vld [vmem:[#allocation2 + $0x68] sm:$0xff]  ;;  %v51_v24 = vpack.c.bf16 %v38_v19, %v1076_v18  ;;  %v40_v27 = vld [vmem:[#allocation2 + $0x38] sm:$0xff]  ;;  %v1091_v28 = vld [vmem:[#allocation2 + $0x70] sm:$0xff] }
  0x1b   :  { %805 = vmatprep.mubr.bf16.mxu1 %v53_v9  ;;  %v55_v25 = vpack.c.bf16 %v1080_v21, %v1078_v20  ;;  %v48_v29 = vld [vmem:[#allocation2 + $0x78] sm:$0xff]  ;;  %v52_v30 = vpack.c.bf16 %v40_v27, %v1089_v26  ;;  %v1098_v32 = vld [vmem:[%s1325_s2] ss:$0 sm:$0xff] }
  0x1c   :  { %v56_v31 = vpack.c.bf16 %v48_v29, %v1091_v28  ;;  %v1113_v59 = vld [vmem:[%s1326_s3] ss:$0 sm:$0xff]  ;;  %s991_s3 = smov [#allocation5]  }
  0x1d   :  { %786 = vmatpush3.bf16.msra.mxu0 %v835_v2  ;;  %823 = vmatpush3.bf16.msra.mxu1 %v835_v2  ;;  %s743_s20 = sshll.u32 %s991_s3, 4  ;;  %s744_s20 = int_to_ptr.vmem [resolvable:$true] %s743_s20 }
  0x1e   :  { %787 = vmatprep.subr.bf16.mxu0 %v836_v3  ;;  %816 = vmatprep.subr.bf16.mxu1 %v836_v3  ;;  %s962_s21 = scalar_lea.vmem %s744_s20, 256  ;;  %p967_p9 = scmp.lt.s32.totalorder %s744_s20, %s744_s20 }
  0x1f   :  { %p963_p8 = scmp.ne.s32.totalorder %s744_s20, %s962_s21  ;;  %p968_p10 = scmp.lt.s32.totalorder %s962_s21, %s962_s21 }
  0x21   :  { %788 = vmatpush3.bf16.msra.mxu0 %v836_v3  ;;  %824 = vmatpush3.bf16.msra.mxu1 %v836_v3  ;;  %p969_p11 = por %p968_p10, %p967_p9 }
  0x22   :  { %789 = vmatprep.subr.bf16.mxu0 %v837_v10  ;;  %817 = vmatprep.subr.bf16.mxu1 %v837_v10 }
  0x23   :  { %p970_p12 = pnand %p969_p11, %p963_p8 }
  0x25   :  { %790 = vmatpush3.bf16.msra.mxu0 %v837_v10  ;;  %825 = vmatpush3.bf16.msra.mxu1 %v837_v10 }
  0x26   :  { %791 = vmatprep.subr.bf16.mxu0 %v838_v11  ;;  %818 = vmatprep.subr.bf16.mxu1 %v838_v11 }
  0x29   :  { %792 = vmatpush3.bf16.msra.mxu0 %v838_v11  ;;  %826 = vmatpush3.bf16.msra.mxu1 %v838_v11 }
  0x2a   :  { %793 = vmatprep.subr.bf16.mxu0 %v839_v12  ;;  %819 = vmatprep.subr.bf16.mxu1 %v839_v12 }
  0x2d   :  { %794 = vmatpush3.bf16.msra.mxu0 %v839_v12  ;;  %827 = vmatpush3.bf16.msra.mxu1 %v839_v12 }
  0x2e   :  { %795 = vmatprep.subr.bf16.mxu0 %v840_v13  ;;  %820 = vmatprep.subr.bf16.mxu1 %v840_v13 }
  0x31   :  { %796 = vmatpush3.bf16.msra.mxu0 %v840_v13  ;;  %828 = vmatpush3.bf16.msra.mxu1 %v840_v13 }
  0x34   :  { %798 = vmatmul.mubr.bf16.vlgmr.msra.gmra.mrb[0].mxu0 %v50_v22  ;;  %806 = vmatmul.mubr.bf16.vlgmr.msra.gmra.mrb[0].mxu1 %v54_v23 }
  0x35   :  { %801 = vmatprep.mubr.bf16.mxu0 %v51_v24  ;;  %809 = vmatprep.mubr.bf16.mxu1 %v55_v25 }
  0x3c   :  { %802 = vmatmul.mubr.bf16.gmra.mrb[4].mxu0 %v52_v30  ;;  %810 = vmatmul.mubr.bf16.gmra.mrb[4].mxu1 %v56_v31 }
 0x107   :  { %v799_v33 = vpop.f32.mrb[0].mxu0  ;;  %v807_v34 = vpop.f32.mrb[0].mxu1 }
 0x108   :  { %v171_v35 = vadd.f32 %v799_v33, %v1098_v32  ;;  %v203_v36 = vadd.f32 %v807_v34, %v1098_v32  ;;  %v162_v37 = vpop.f32.mrb[1].mxu0  ;;  %v194_v38 = vpop.f32.mrb[1].mxu1 }
 0x109   :  { %v163_v39 = vadd.f32 %v1098_v32, %v162_v37  ;;  %v195_v40 = vadd.f32 %v1098_v32, %v194_v38  ;;  %v800_v41 = vpop.f32.mrb[2].mxu0  ;;  %v808_v42 = vpop.f32.mrb[2].mxu1 }
 0x10a   :  { %841 = vtanh.f32 %v171_v35  ;;  %v174_v43 = vadd.f32 %v800_v41, %v1098_v32  ;;  %v165_v44 = vpop.f32.mrb[3].mxu0  ;;  %v197_v45 = vpop.f32.mrb[3].mxu1  ;;  %v206_v46 = vadd.f32 %v808_v42, %v1098_v32 }
 0x10b   :  { %843 = vtanh.f32 %v203_v36  ;;  %v166_v47 = vadd.f32 %v1098_v32, %v165_v44  ;;  %v198_v48 = vadd.f32 %v1098_v32, %v197_v45 }
 0x10c   :  { %845 = vtanh.f32 %v163_v39 }
 0x10d   :  { %847 = vtanh.f32 %v195_v40 }
 0x10e   :  { %849 = vtanh.f32 %v174_v43 }
 0x10f   :  { %851 = vtanh.f32 %v206_v46  ;;  %v803_v49 = vpop.f32.mrb[4].mxu0  ;;  %v811_v50 = vpop.f32.mrb[4].mxu1 }
 0x110   :  { %v187_v51 = vadd.f32 %v803_v49, %v1098_v32  ;;  %v178_v52 = vpop.f32.mrb[5].mxu0  ;;  %v210_v53 = vpop.f32.mrb[5].mxu1  ;;  %v219_v54 = vadd.f32 %v811_v50, %v1098_v32  ;;  %853 = vtanh.f32 %v166_v47 }
 0x111   :  { %v804_v55 = vpop.f32.mrb[6].mxu0  ;;  %v812_v56 = vpop.f32.mrb[6].mxu1  ;;  %855 = vtanh.f32 %v198_v48  ;;  %v179_v0 = vadd.f32 %v1098_v32, %v178_v52  ;;  %v211_v3 = vadd.f32 %v1098_v32, %v210_v53 }
 0x112   :  { %v181_v57 = vpop.f32.mrb[7].mxu0  ;;  %v213_v58 = vpop.f32.mrb[7].mxu1  ;;  %857 = vtanh.f32 %v187_v51  ;;  %v190_v33 = vadd.f32 %v804_v55, %v1098_v32  ;;  %v222_v35 = vadd.f32 %v812_v56, %v1098_v32 }
 0x113   :  { %859 = vtanh.f32 %v219_v54  ;;  %v182_v19 = vadd.f32 %v1098_v32, %v181_v57  ;;  %v214_v22 = vadd.f32 %v1098_v32, %v213_v58 }
 0x114   :  { %v842_v60 = vpop.eup %841  ;;  %861 = vtanh.f32 %v179_v0 }
 0x115   :  { %v844_v61 = vpop.eup %843  ;;  %v250_v62 = vmul.f32 %v842_v60, %v1113_v59  ;;  %863 = vtanh.f32 %v211_v3 }
 0x116   :  { %v846_v63 = vpop.eup %845  ;;  %v258_v1 = vmul.f32 %v844_v61, %v1113_v59  ;;  %865 = vtanh.f32 %v182_v19 }
 0x117   :  { %v848_v2 = vpop.eup %847  ;;  %v271_v7 = vsel %vm264_vm0, %v250_v62, 0.0  ;;  %v248_v9 = vmul.f32 %v846_v63, %v1113_v59  ;;  %867 = vtanh.f32 %v214_v22 }
 0x118   :  { %v850_v10 = vpop.eup %849  ;;  %v295_v11 = vsel %vm264_vm0, %v258_v1, 0.0  ;;  %272 = vadd.xlane.f32.xlu0 %v271_v7  ;;  %v256_v12 = vmul.f32 %v848_v2, %v1113_v59  ;;  %869 = vtanh.f32 %v190_v33 }
 0x119   :  { %v852_v13 = vpop.eup %851  ;;  %296 = vadd.xlane.f32.xlu1 %v295_v11  ;;  %v265_v23 = vsel %vm264_vm0, %v248_v9, 0.0  ;;  %v251_v24 = vmul.f32 %v850_v10, %v1113_v59  ;;  %871 = vtanh.f32 %v222_v35 }
 0x11a   :  { %v854_v25 = vpop.eup %853  ;;  %v289_v27 = vsel %vm264_vm0, %v256_v12, 0.0  ;;  %v259_v29 = vmul.f32 %v852_v13, %v1113_v59 }
 0x11b   :  { %v856_v30 = vpop.eup %855  ;;  %v274_v36 = vsel %vm264_vm0, %v251_v24, 0.0  ;;  %v249_v37 = vmul.f32 %v854_v25, %v1113_v59 }
 0x11c   :  { %266 = vadd.xlane.f32.xlu0 %v265_v23  ;;  %v858_v31 = vpop.eup %857  ;;  %v298_v38 = vsel %vm264_vm0, %v259_v29, 0.0  ;;  %v257_v39 = vmul.f32 %v856_v30, %v1113_v59 }
 0x11d   :  { %290 = vadd.xlane.f32.xlu1 %v289_v27  ;;  %v860_v34 = vpop.eup %859  ;;  %v254_v40 = vmul.f32 %v858_v31, %v1113_v59  ;;  %v268_v42 = vsel %vm264_vm0, %v249_v37, 0.0 }
 0x11e   :  { %v262_v41 = vmul.f32 %v860_v34, %v1113_v59  ;;  %v862_v32 = vpop.eup %861  ;;  %v292_v43 = vsel %vm264_vm0, %v257_v39, 0.0 }
 0x11f   :  { %v864_v44 = vpop.eup %863  ;;  %v283_v45 = vsel %vm264_vm0, %v254_v40, 0.0  ;;  %v252_v47 = vmul.f32 %v862_v32, %v1113_v59 }
 0x120   :  { %275 = vadd.xlane.f32.xlu0 %v274_v36  ;;  %v307_v46 = vsel %vm264_vm0, %v262_v41, 0.0  ;;  %v866_v48 = vpop.eup %865  ;;  %v260_v49 = vmul.f32 %v864_v44, %v1113_v59 }
 0x121   :  { %299 = vadd.xlane.f32.xlu1 %v298_v38  ;;  %v868_v50 = vpop.eup %867  ;;  %v277_v51 = vsel %vm264_vm0, %v252_v47, 0.0  ;;  %v253_v52 = vmul.f32 %v866_v48, %v1113_v59 }
 0x122   :  { %v870_v53 = vpop.eup %869  ;;  %v301_v54 = vsel %vm264_vm0, %v260_v49, 0.0  ;;  %v261_v55 = vmul.f32 %v868_v50, %v1113_v59 }
 0x123   :  { %v872_v56 = vpop.eup %871  ;;  %v280_v57 = vsel %vm264_vm0, %v253_v52, 0.0  ;;  %v255_v58 = vmul.f32 %v870_v53, %v1113_v59 }
 0x124   :  { %269 = vadd.xlane.f32.xlu0 %v268_v42  ;;  %v304_v60 = vsel %vm264_vm0, %v261_v55, 0.0  ;;  %v263_v61 = vmul.f32 %v872_v56, %v1113_v59 }
 0x125   :  { %293 = vadd.xlane.f32.xlu1 %v292_v43  ;;  %v286_v62 = vsel %vm264_vm0, %v255_v58, 0.0 }
 0x126   :  { %v310_v63 = vsel %vm264_vm0, %v263_v61, 0.0 }
 0x128   :  { %284 = vadd.xlane.f32.xlu0 %v283_v45 }
 0x129   :  { %308 = vadd.xlane.f32.xlu1 %v307_v46 }
 0x12c   :  { %278 = vadd.xlane.f32.xlu0 %v277_v51 }
 0x12d   :  { %302 = vadd.xlane.f32.xlu1 %v301_v54 }
 0x130   :  { %281 = vadd.xlane.f32.xlu0 %v280_v57 }
 0x131   :  { %305 = vadd.xlane.f32.xlu1 %v304_v60 }
 0x134   :  { %287 = vadd.xlane.f32.xlu0 %v286_v62 }
 0x135   :  { %311 = vadd.xlane.f32.xlu1 %v310_v63 }
 0x1a5   :  { %v273_v0 = vpop.xlane.xlu0 %272 }
 0x1a6   :  { %v297_v1 = vpop.xlane.xlu1 %296  ;;  %v325_v2 = vrot.slane %v273_v0, 4 }
 0x1a7   :  { %v373_v3 = vrot.slane %v297_v1, 4 }
 0x1a8   :  { %v326_v7 = vmax.f32 %v273_v0, %v325_v2 }
 0x1a9   :  { %v374_v9 = vmax.f32 %v297_v1, %v373_v3  ;;  %v267_v10 = vpop.xlane.xlu0 %266 }
 0x1aa   :  { %v327_v11 = vrot.slane %v326_v7, 2  ;;  %v291_v12 = vpop.xlane.xlu1 %290  ;;  %v313_v13 = vrot.slane %v267_v10, 4 }
 0x1ab   :  { %v375_v19 = vrot.slane %v374_v9, 2  ;;  %v361_v22 = vrot.slane %v291_v12, 4 }
 0x1ac   :  { %v328_v59 = vmax.f32 %v326_v7, %v327_v11  ;;  %v314_v23 = vmax.f32 %v267_v10, %v313_v13 }
 0x1ad   :  { %v376_v24 = vmax.f32 %v374_v9, %v375_v19  ;;  %v362_v25 = vmax.f32 %v291_v12, %v361_v22  ;;  %v276_v27 = vpop.xlane.xlu0 %275 }
 0x1ae   :  { %v329_v29 = vrot.slane %v328_v59, 1  ;;  %v315_v30 = vrot.slane %v314_v23, 2  ;;  %v300_v31 = vpop.xlane.xlu1 %299  ;;  %v331_v33 = vrot.slane %v276_v27, 4 }
 0x1af   :  { %v377_v34 = vrot.slane %v376_v24, 1  ;;  %v363_v35 = vrot.slane %v362_v25, 2  ;;  %v379_v36 = vrot.slane %v300_v31, 4 }
 0x1b0   :  { %v330_v37 = vmax.f32 %v328_v59, %v329_v29  ;;  %v316_v38 = vmax.f32 %v314_v23, %v315_v30  ;;  %v332_v39 = vmax.f32 %v276_v27, %v331_v33 }
 0x1b1   :  { %v378_v40 = vmax.f32 %v376_v24, %v377_v34  ;;  %v364_v41 = vmax.f32 %v362_v25, %v363_v35  ;;  %v380_v42 = vmax.f32 %v300_v31, %v379_v36  ;;  %v1153_v32 = vpop.xlane.xlu0 %269 }
 0x1b2   :  { %v411_v43 = vsub.f32 %v273_v0, %v330_v37  ;;  %v317_v44 = vrot.slane %v316_v38, 1  ;;  %v333_v45 = vrot.slane %v332_v39, 2  ;;  %v1155_v46 = vpop.xlane.xlu1 %293  ;;  %v319_v47 = vrot.slane %v1153_v32, 4 }
 0x1b3   :  { %v419_v48 = vsub.f32 %v297_v1, %v378_v40  ;;  %v365_v49 = vrot.slane %v364_v41, 1  ;;  %v381_v50 = vrot.slane %v380_v42, 2  ;;  %v367_v51 = vrot.slane %v1155_v46, 4 }
 0x1b4   :  { %v429_v52 = vmul.f32 1.442695, %v411_v43  ;;  %v318_v53 = vmax.f32 %v316_v38, %v317_v44  ;;  %v334_v54 = vmax.f32 %v332_v39, %v333_v45  ;;  %v320_v55 = vmax.f32 %v1153_v32, %v319_v47 }
 0x1b5   :  { %v445_v56 = vmul.f32 1.442695, %v419_v48  ;;  %v366_v57 = vmax.f32 %v364_v41, %v365_v49  ;;  %v382_v58 = vmax.f32 %v380_v42, %v381_v50  ;;  %v368_v60 = vmax.f32 %v1155_v46, %v367_v51  ;;  %v1161_v61 = vpop.xlane.xlu0 %284 }
 0x1b6   :  { %873 = vpow2.f32 %v429_v52  ;;  %v409_v62 = vsub.f32 %v267_v10, %v318_v53  ;;  %v335_v63 = vrot.slane %v334_v54, 1  ;;  %v321_v0 = vrot.slane %v320_v55, 2  ;;  %v1163_v1 = vpop.xlane.xlu1 %308 }
 0x1b7   :  { %875 = vpow2.f32 %v445_v56  ;;  %v417_v2 = vsub.f32 %v291_v12, %v366_v57  ;;  %v383_v3 = vrot.slane %v382_v58, 1  ;;  %v369_v7 = vrot.slane %v368_v60, 2 }
 0x1b8   :  { %v425_v9 = vmul.f32 1.442695, %v409_v62  ;;  %v336_v11 = vmax.f32 %v334_v54, %v335_v63  ;;  %v322_v13 = vmax.f32 %v320_v55, %v321_v0  ;;  %v397_v19 = vrot.slane %v1163_v1, 4 }
 0x1b9   :  { %v441_v22 = vmul.f32 1.442695, %v417_v2  ;;  %v384_v59 = vmax.f32 %v382_v58, %v383_v3  ;;  %v370_v23 = vmax.f32 %v368_v60, %v369_v7  ;;  %v349_v24 = vrot.slane %v1161_v61, 4  ;;  %v1170_v12 = vpop.xlane.xlu0 %278 }
 0x1ba   :  { %877 = vpow2.f32 %v425_v9  ;;  %v412_v10 = vsub.f32 %v276_v27, %v336_v11  ;;  %v323_v25 = vrot.slane %v322_v13, 1  ;;  %v398_v29 = vmax.f32 %v1163_v1, %v397_v19  ;;  %v1168_v30 = vpop.xlane.xlu1 %302 }
 0x1bb   :  { %879 = vpow2.f32 %v441_v22  ;;  %v420_v33 = vsub.f32 %v300_v31, %v384_v59  ;;  %v371_v34 = vrot.slane %v370_v23, 1  ;;  %v350_v35 = vmax.f32 %v1161_v61, %v349_v24 }
 0x1bc   :  { %v431_v36 = vmul.f32 1.442695, %v412_v10  ;;  %v324_v37 = vmax.f32 %v322_v13, %v323_v25  ;;  %v399_v38 = vrot.slane %v398_v29, 2  ;;  %v385_v39 = vrot.slane %v1168_v30, 4 }
 0x1bd   :  { %v447_v40 = vmul.f32 1.442695, %v420_v33  ;;  %v372_v41 = vmax.f32 %v370_v23, %v371_v34  ;;  %v351_v27 = vrot.slane %v350_v35, 2  ;;  %v337_v42 = vrot.slane %v1170_v12, 4 }
 0x1be   :  { %881 = vpow2.f32 %v431_v36  ;;  %v410_v43 = vsub.f32 %v1153_v32, %v324_v37  ;;  %v400_v44 = vmax.f32 %v398_v29, %v399_v38  ;;  %v386_v45 = vmax.f32 %v1168_v30, %v385_v39  ;;  %v1194_v59 = vpop.xlane.xlu1 %305 }
 0x1bf   :  { %883 = vpow2.f32 %v447_v40  ;;  %v418_v31 = vsub.f32 %v1155_v46, %v372_v41  ;;  %v352_v47 = vmax.f32 %v350_v35, %v351_v27  ;;  %v338_v48 = vmax.f32 %v1170_v12, %v337_v42 }
 0x1c0   :  { %v1179_v49 = vpop.eup %873  ;;  %v427_v50 = vmul.f32 1.442695, %v410_v43  ;;  %v401_v51 = vrot.slane %v400_v44, 1  ;;  %v387_v52 = vrot.slane %v386_v45, 2  ;;  %v391_v36 = vrot.slane %v1194_v59, 4 }
 0x1c1   :  { %v1181_v53 = vpop.eup %875  ;;  %v469_v54 = vrot.slane %v1179_v49, 4  ;;  %v443_v55 = vmul.f32 1.442695, %v418_v31  ;;  %v353_v32 = vrot.slane %v352_v47, 1  ;;  %v339_v56 = vrot.slane %v338_v48, 2 }
 0x1c2   :  { %v517_v57 = vrot.slane %v1181_v53, 4  ;;  %885 = vpow2.f32 %v427_v50  ;;  %v402_v58 = vmax.f32 %v400_v44, %v401_v51  ;;  %v388_v46 = vmax.f32 %v386_v45, %v387_v52 }
 0x1c3   :  { %v470_v60 = vadd.f32 %v1179_v49, %v469_v54  ;;  %887 = vpow2.f32 %v443_v55  ;;  %v354_v62 = vmax.f32 %v352_v47, %v353_v32  ;;  %v340_v63 = vmax.f32 %v338_v48, %v339_v56  ;;  %v1216_v54 = vpop.xlane.xlu0 %281 }
 0x1c4   :  { %v1186_v0 = vpop.eup %877  ;;  %v518_v2 = vadd.f32 %v1181_v53, %v517_v57  ;;  %v423_v3 = vsub.f32 %v1163_v1, %v402_v58  ;;  %v389_v7 = vrot.slane %v388_v46, 1 }
 0x1c5   :  { %v1190_v9 = vpop.eup %879  ;;  %v471_v11 = vrot.slane %v470_v60, 2  ;;  %v457_v13 = vrot.slane %v1186_v0, 4  ;;  %v415_v19 = vsub.f32 %v1161_v61, %v354_v62  ;;  %v341_v22 = vrot.slane %v340_v63, 1 }
 0x1c6   :  { %v519_v23 = vrot.slane %v518_v2, 2  ;;  %v505_v24 = vrot.slane %v1190_v9, 4  ;;  %v453_v10 = vmul.f32 1.442695, %v423_v3  ;;  %v390_v25 = vmax.f32 %v388_v46, %v389_v7 }
 0x1c7   :  { %v458_v29 = vadd.f32 %v1186_v0, %v457_v13  ;;  %v437_v33 = vmul.f32 1.442695, %v415_v19  ;;  %v342_v1 = vmax.f32 %v340_v63, %v341_v22  ;;  %v472_v37 = vadd.f32 %v471_v11, %v470_v60 }
 0x1c8   :  { %v1198_v34 = vpop.eup %881  ;;  %889 = vpow2.f32 %v453_v10  ;;  %v421_v35 = vsub.f32 %v1168_v30, %v390_v25  ;;  %v506_v38 = vadd.f32 %v1190_v9, %v505_v24  ;;  %v520_v39 = vadd.f32 %v519_v23, %v518_v2 }
 0x1c9   :  { %v1202_v61 = vpop.eup %883  ;;  %891 = vpow2.f32 %v437_v33  ;;  %v475_v40 = vrot.slane %v1198_v34, 4  ;;  %v459_v27 = vrot.slane %v458_v29, 2  ;;  %v413_v43 = vsub.f32 %v1170_v12, %v342_v1 }
 0x1ca   :  { %v449_v41 = vmul.f32 1.442695, %v421_v35  ;;  %v523_v42 = vrot.slane %v1202_v61, 4  ;;  %v392_v30 = vmax.f32 %v1194_v59, %v391_v36  ;;  %v473_v31 = vrot.slane %v472_v37, 1  ;;  %v1228_v35 = vpop.xlane.xlu1 %311 }
 0x1cb   :  { %v507_v47 = vrot.slane %v506_v38, 2  ;;  %v521_v50 = vrot.slane %v520_v39, 1  ;;  %v476_v51 = vadd.f32 %v1198_v34, %v475_v40  ;;  %v460_v55 = vadd.f32 %v459_v27, %v458_v29 }
 0x1cc   :  { %v1208_v44 = vpop.eup %885  ;;  %893 = vpow2.f32 %v449_v41  ;;  %v524_v12 = vadd.f32 %v1202_v61, %v523_v42  ;;  %v433_v56 = vmul.f32 1.442695, %v413_v43  ;;  %v393_v58 = vrot.slane %v392_v30, 2 }
 0x1cd   :  { %v1211_v45 = vpop.eup %887  ;;  %v463_v48 = vrot.slane %v1208_v44, 4  ;;  %v474_v46 = vadd.f32 %v473_v31, %v472_v37  ;;  %v508_v60 = vadd.f32 %v507_v47, %v506_v38  ;;  %v343_v63 = vrot.slane %v1216_v54, 4 }
 0x1ce   :  { %v511_v52 = vrot.slane %v1211_v45, 4  ;;  %v522_v3 = vadd.f32 %v521_v50, %v520_v39  ;;  %v477_v7 = vrot.slane %v476_v51, 2  ;;  %v394_v13 = vmax.f32 %v392_v30, %v393_v58 }
 0x1cf   :  { %v464_v32 = vadd.f32 %v1208_v44, %v463_v48  ;;  %v461_v22 = vrot.slane %v460_v55, 1  ;;  %v525_v23 = vrot.slane %v524_v12, 2  ;;  %895 = vpow2.f32 %v433_v56  ;;  %v1236_v48 = vpop.xlane.xlu0 %287 }
 0x1d0   :  { %v512_v57 = vadd.f32 %v1211_v45, %v511_v52  ;;  %v395_v25 = vrot.slane %v394_v13, 1  ;;  %897 = vrcp.f32 %v474_v46  ;;  %v509_v29 = vrot.slane %v508_v60, 1 }
 0x1d1   :  { %v465_v62 = vrot.slane %v464_v32, 2  ;;  %v344_v1 = vmax.f32 %v1216_v54, %v343_v63  ;;  %899 = vrcp.f32 %v522_v3  ;;  %v478_v37 = vadd.f32 %v477_v7, %v476_v51 }
 0x1d2   :  { %v1222_v2 = vpop.eup %889  ;;  %v513_v11 = vrot.slane %v512_v57, 2  ;;  %v396_v39 = vmax.f32 %v394_v13, %v395_v25  ;;  %v462_v40 = vadd.f32 %v461_v22, %v460_v55  ;;  %v526_v41 = vadd.f32 %v525_v23, %v524_v12 }
 0x1d3   :  { %v1224_v19 = vpop.eup %891  ;;  %v466_v10 = vadd.f32 %v465_v62, %v464_v32  ;;  %v541_v38 = vrot.slane %v1222_v2, 4  ;;  %v345_v42 = vrot.slane %v344_v1, 2  ;;  %v403_v47 = vrot.slane %v1228_v35, 4 }
 0x1d4   :  { %v514_v24 = vadd.f32 %v513_v11, %v512_v57  ;;  %v493_v33 = vrot.slane %v1224_v19, 4  ;;  %v422_v31 = vsub.f32 %v1194_v59, %v396_v39  ;;  %v510_v50 = vadd.f32 %v509_v29, %v508_v60 }
 0x1d5   :  { %v467_v30 = vrot.slane %v466_v10, 1  ;;  %v346_v32 = vmax.f32 %v344_v1, %v345_v42  ;;  %v479_v56 = vrot.slane %v478_v37, 1  ;;  %v542_v55 = vadd.f32 %v1222_v2, %v541_v38 }
 0x1d6   :  { %v1230_v36 = vpop.eup %893  ;;  %v515_v43 = vrot.slane %v514_v24, 1  ;;  %v494_v52 = vadd.f32 %v1224_v19, %v493_v33  ;;  %v451_v12 = vmul.f32 1.442695, %v422_v31  ;;  %v404_v57 = vmax.f32 %v1228_v35, %v403_v47 }
 0x1d7   :  { %v529_v27 = vrot.slane %v1230_v36, 4  ;;  %v527_v58 = vrot.slane %v526_v41, 1  ;;  %v347_v62 = vrot.slane %v346_v32, 1  ;;  %v355_v59 = vrot.slane %v1236_v48, 4 }
 0x1d8   :  { %v516_v63 = vadd.f32 %v515_v43, %v514_v24  ;;  %v468_v3 = vadd.f32 %v467_v30, %v466_v10  ;;  %901 = vpow2.f32 %v451_v12  ;;  %v405_v60 = vrot.slane %v404_v57, 2 }
 0x1d9   :  { %v530_v51 = vadd.f32 %v1230_v36, %v529_v27  ;;  %v1243_v7 = vpop.eup %895  ;;  %v495_v11 = vrot.slane %v494_v52, 2  ;;  %v348_v22 = vmax.f32 %v346_v32, %v347_v62  ;;  %v356_v23 = vmax.f32 %v1236_v48, %v355_v59 }
 0x1da   :  { %v480_v25 = vadd.f32 %v479_v56, %v478_v37  ;;  %v543_v29 = vrot.slane %v542_v55, 2  ;;  %v481_v33 = vrot.slane %v1243_v7, 4  ;;  %v406_v1 = vmax.f32 %v404_v57, %v405_v60  ;;  %v898_v38 = vpop.eup %897 }
 0x1db   :  { %v531_v46 = vrot.slane %v530_v51, 2  ;;  %903 = vrcp.f32 %v462_v40  ;;  %v414_v24 = vsub.f32 %v1216_v54, %v348_v22  ;;  %v357_v10 = vrot.slane %v356_v23, 2  ;;  %v900_v27 = vpop.eup %899 }
 0x1dc   :  { %v528_v42 = vadd.f32 %v527_v58, %v526_v41  ;;  %905 = vrcp.f32 %v468_v3  ;;  %v482_v43 = vadd.f32 %v1243_v7, %v481_v33  ;;  %v407_v30 = vrot.slane %v406_v1, 1 }
 0x1dd   :  { %v532_v13 = vadd.f32 %v531_v46, %v530_v51  ;;  %907 = vrcp.f32 %v516_v63  ;;  %v496_v31 = vadd.f32 %v495_v11, %v494_v52  ;;  %v435_v47 = vmul.f32 1.442695, %v414_v24 }
 0x1de   :  { %v358_v37 = vmax.f32 %v356_v23, %v357_v10  ;;  %909 = vrcp.f32 %v480_v25  ;;  %v544_v51 = vadd.f32 %v543_v29, %v542_v55  ;;  %v483_v32 = vrot.slane %v482_v43, 2 }
 0x1df   :  { %v533_v39 = vrot.slane %v532_v13, 1  ;;  %v408_v56 = vmax.f32 %v406_v1, %v407_v30  ;;  %911 = vrcp.f32 %v510_v50  ;;  %v497_v58 = vrot.slane %v496_v31, 1 }
 0x1e0   :  { %v359_v12 = vrot.slane %v358_v37, 1  ;;  %v484_v57 = vadd.f32 %v483_v32, %v482_v43  ;;  %913 = vpow2.f32 %v435_v47  ;;  %v545_v59 = vrot.slane %v544_v51, 1 }
 0x1e1   :  { %v534_v40 = vadd.f32 %v533_v39, %v532_v13  ;;  %v424_v54 = vsub.f32 %v1228_v35, %v408_v56  ;;  %915 = vrcp.f32 %v528_v42  ;;  %v498_v35 = vadd.f32 %v497_v58, %v496_v31 }
 0x1e2   :  { %v360_v41 = vmax.f32 %v358_v37, %v359_v12  ;;  %v1250_v46 = vpop.eup %901  ;;  %v485_v62 = vrot.slane %v484_v57, 1  ;;  %v546_v22 = vadd.f32 %v545_v59, %v544_v51  ;;  %v571_v42 = vmul.f32 %v898_v38, %v1179_v49 }
 0x1e3   :  { %v455_v52 = vmul.f32 1.442695, %v424_v54  ;;  %917 = vrcp.f32 %v534_v40  ;;  %v535_v55 = vrot.slane %v1250_v46, 4  ;;  %v579_v49 = vmul.f32 %v900_v27, %v1181_v53 }
 0x1e4   :  { %v416_v63 = vsub.f32 %v1236_v48, %v360_v41  ;;  %v486_v50 = vadd.f32 %v485_v62, %v484_v57  ;;  %v587_v40 = vmul.f32 %v571_v42, %v1068_v14 }
 0x1e5   :  { %919 = vpow2.f32 %v455_v52  ;;  %v904_v3 = vpop.eup %903  ;;  %v536_v60 = vadd.f32 %v1250_v46, %v535_v55  ;;  %v595_v27 = vmul.f32 %v579_v49, %v1072_v16 }
 0x1e6   :  { %v439_v11 = vmul.f32 1.442695, %v416_v63  ;;  %v906_v13 = vpop.eup %905  ;;  %921 = vrcp.f32 %v486_v50  ;;  %v569_v33 = vmul.f32 %v904_v3, %v1186_v0  ;;  %v613_v62 = vrot.slane %v587_v40, 4 }
 0x1e7   :  { %v908_v23 = vpop.eup %907  ;;  %v537_v25 = vrot.slane %v536_v60, 2  ;;  %v570_v39 = vmul.f32 %v906_v13, %v1208_v44 }
 0x1e8   :  { %923 = vpow2.f32 %v439_v11  ;;  %v910_v29 = vpop.eup %909  ;;  %v578_v10 = vmul.f32 %v908_v23, %v1211_v45  ;;  %v585_v37 = vmul.f32 %v569_v33, %v1044_v4 }
 0x1e9   :  { %v912_v1 = vpop.eup %911  ;;  %v538_v48 = vadd.f32 %v537_v25, %v536_v60  ;;  %925 = vrcp.f32 %v498_v35  ;;  %v572_v47 = vmul.f32 %v910_v29, %v1198_v34  ;;  %v586_v56 = vmul.f32 %v570_v39, %v1046_v5 }
 0x1ea   :  { %v1257_v24 = vpop.eup %913  ;;  %927 = vrcp.f32 %v546_v22  ;;  %v577_v0 = vmul.f32 %v912_v1, %v1190_v9  ;;  %v594_v34 = vmul.f32 %v578_v10, %v1052_v8  ;;  %v601_v5 = vrot.slane %v585_v37, 4 }
 0x1eb   :  { %v916_v43 = vpop.eup %915  ;;  %v539_v30 = vrot.slane %v538_v48, 1  ;;  %v487_v31 = vrot.slane %v1257_v24, 4  ;;  %v588_v4 = vmul.f32 %v572_v47, %v1070_v15  ;;  %v607_v14 = vrot.slane %v586_v56, 4 }
 0x1ec   :  { %v580_v38 = vmul.f32 %v916_v43, %v1202_v61  ;;  %v593_v54 = vmul.f32 %v577_v0, %v1048_v6  ;;  %v655_v52 = vrot.slane %v594_v34, 4  ;;  %v602_v11 = vadd.f32 %v601_v5, %v585_v37 }
 0x1ed   :  { %v918_v44 = vpop.eup %917  ;;  %v488_v51 = vadd.f32 %v1257_v24, %v487_v31  ;;  %v540_v32 = vadd.f32 %v539_v30, %v538_v48  ;;  %v619_v63 = vrot.slane %v588_v4, 4  ;;  %v608_v16 = vadd.f32 %v607_v14, %v586_v56 }
 0x1ee   :  { %v581_v61 = vmul.f32 %v918_v44, %v1230_v36  ;;  %v596_v6 = vmul.f32 %v580_v38, %v1074_v17  ;;  %v649_v36 = vrot.slane %v593_v54, 4  ;;  %v614_v29 = vadd.f32 %v613_v62, %v587_v40 }
 0x1ef   :  { %v1267_v45 = vpop.eup %919  ;;  %v489_v12 = vrot.slane %v488_v51, 2  ;;  %929 = vrcp.f32 %v540_v32  ;;  %v656_v33 = vadd.f32 %v655_v52, %v594_v34  ;;  %v661_v39 = vrot.slane %v595_v27, 4 }
 0x1f0   :  { %v547_v9 = vrot.slane %v1267_v45, 4  ;;  %v922_v57 = vpop.eup %921  ;;  %v597_v22 = vmul.f32 %v581_v61, %v1078_v20  ;;  %v603_v10 = vrot.slane %v602_v11, 2  ;;  %v650_v42 = vadd.f32 %v649_v36, %v593_v54 }
 0x1f1   :  { %v490_v58 = vadd.f32 %v489_v12, %v488_v51  ;;  %v573_v60 = vmul.f32 %v922_v57, %v1243_v7  ;;  %v609_v31 = vrot.slane %v608_v16, 2  ;;  %v667_v20 = vrot.slane %v596_v6, 4 }
 0x1f2   :  { %v1276_v41 = vpop.eup %923  ;;  %v548_v53 = vadd.f32 %v1267_v45, %v547_v9  ;;  %v673_v47 = vrot.slane %v597_v22, 4  ;;  %v657_v44 = vrot.slane %v656_v33, 2  ;;  %v615_v51 = vrot.slane %v614_v29, 2 }
 0x1f3   :  { %v499_v8 = vrot.slane %v1276_v41, 4  ;;  %v926_v59 = vpop.eup %925  ;;  %v491_v15 = vrot.slane %v490_v58, 1  ;;  %v589_v7 = vmul.f32 %v573_v60, %v1076_v18  ;;  %v662_v32 = vadd.f32 %v661_v39, %v595_v27 }
 0x1f4   :  { %v549_v55 = vrot.slane %v548_v53, 2  ;;  %v928_v50 = vpop.eup %927  ;;  %v575_v25 = vmul.f32 %v926_v59, %v1224_v19  ;;  %v651_v38 = vrot.slane %v650_v42, 2  ;;  %v604_v40 = vadd.f32 %v603_v10, %v602_v11 }
 0x1f5   :  { %v500_v3 = vadd.f32 %v1276_v41, %v499_v8  ;;  %v492_v13 = vadd.f32 %v491_v15, %v490_v58  ;;  %v583_v17 = vmul.f32 %v928_v50, %v1222_v2  ;;  %v625_v49 = vrot.slane %v589_v7, 4 }
 0x1f6   :  { %v550_v35 = vadd.f32 %v549_v55, %v548_v53  ;;  %v591_v37 = vmul.f32 %v575_v25, %v1089_v26  ;;  %v620_v34 = vadd.f32 %v619_v63, %v588_v4  ;;  %v668_v12 = vadd.f32 %v667_v20, %v596_v6 }
 0x1f7   :  { %v501_v23 = vrot.slane %v500_v3, 2  ;;  %931 = vrcp.f32 %v492_v13  ;;  %v599_v2 = vmul.f32 %v583_v17, %v1091_v28  ;;  %v674_v9 = vadd.f32 %v673_v47, %v597_v22 }
 0x1f8   :  { %v551_v1 = vrot.slane %v550_v35, 1  ;;  %v658_v57 = vadd.f32 %v657_v44, %v656_v33  ;;  %v610_v54 = vadd.f32 %v609_v31, %v608_v16  ;;  %v637_v26 = vrot.slane %v591_v37, 4 }
 0x1f9   :  { %v502_v48 = vadd.f32 %v501_v23, %v500_v3  ;;  %v930_v43 = vpop.eup %929  ;;  %v663_v5 = vrot.slane %v662_v32, 2  ;;  %v685_v58 = vrot.slane %v599_v2, 4  ;;  %v616_v28 = vadd.f32 %v615_v51, %v614_v29  ;;  %v937_v3 = vld [vmem:[#allocation2 + $0x28] sm:$0xff] }
 0x1fa   :  { %v552_v30 = vadd.f32 %v551_v1, %v550_v35  ;;  %v582_v19 = vmul.f32 %v930_v43, %v1250_v46  ;;  %v626_v53 = vadd.f32 %v625_v49, %v589_v7  ;;  %v652_v61 = vadd.f32 %v651_v38, %v650_v42  ;;  %v938_v42 = vld [vmem:[#allocation2 + $0x78] sm:$0xff] }
 0x1fb   :  { %v503_v0 = vrot.slane %v502_v48, 1  ;;  %v621_v27 = vrot.slane %v620_v34, 2  ;;  %v669_v62 = vrot.slane %v668_v12, 2  ;;  %v675_v52 = vrot.slane %v674_v9, 2 }
 0x1fc   :  { %933 = vrcp.f32 %v552_v30  ;;  %v598_v18 = vmul.f32 %v582_v19, %v1080_v21  ;;  %v605_v21 = vrot.slane %v604_v40, 1  ;;  %v659_v59 = vrot.slane %v658_v57, 1 }
 0x1fd   :  { %v504_v56 = vadd.f32 %v503_v0, %v502_v48  ;;  %v611_v55 = vrot.slane %v610_v54, 1  ;;  %v638_v6 = vadd.f32 %v637_v26, %v591_v37  ;;  %v664_v63 = vadd.f32 %v663_v5, %v662_v32  ;;  %v939_v32 = vld [vmem:[#allocation2 + $0x38] sm:$0xff] }
 0x1fe   :  { %v679_v46 = vrot.slane %v598_v18, 4  ;;  %v686_v50 = vadd.f32 %v685_v58, %v599_v2  ;;  %v617_v11 = vrot.slane %v616_v28, 1  ;;  %v627_v36 = vrot.slane %v626_v53, 2 }
 0x1ff   :  { %935 = vrcp.f32 %v504_v56  ;;  %v653_v35 = vrot.slane %v652_v61, 1  ;;  %v606_v22 = vadd.f32 %v605_v21, %v604_v40  ;;  %v622_v16 = vadd.f32 %v621_v27, %v620_v34 }
 0x200   :  { %v680_v14 = vadd.f32 %v679_v46, %v598_v18  ;;  %v670_v23 = vadd.f32 %v669_v62, %v668_v12  ;;  %v676_v25 = vadd.f32 %v675_v52, %v674_v9  ;;  %v660_v33 = vadd.f32 %v659_v59, %v658_v57 }
 0x201   :  { %v932_v8 = vpop.eup %931  ;;  %v612_v17 = vadd.f32 %v611_v55, %v610_v54  ;;  %v639_v39 = vrot.slane %v638_v6, 2  ;;  %v665_v48 = vrot.slane %v664_v63, 1  ;;  %v687_v7 = vrot.slane %v686_v50, 2 }
 0x202   :  { %v574_v4 = vmul.f32 %v932_v8, %v1257_v24  ;;  %v681_v15 = vrot.slane %v680_v14, 2  ;;  %v628_v30 = vadd.f32 %v627_v36, %v626_v53  ;;  %v654_v20 = vadd.f32 %v653_v35, %v652_v61 }
 0x203   :  { %v618_v0 = vadd.f32 %v617_v11, %v616_v28  ;;  %v671_v19 = vrot.slane %v670_v23, 1  ;;  %v677_v37 = vrot.slane %v676_v25, 1  ;;  %v623_v18 = vrot.slane %v622_v16, 1 }
 0x204   :  { %v590_v60 = vmul.f32 %v937_v3, %v574_v4  ;;  %v682_v1 = vadd.f32 %v681_v15, %v680_v14  ;;  %v727_v51 = vsel %vm713_vm1, %v660_v33, %v654_v20  ;;  %v666_v49 = vadd.f32 %v665_v48, %v664_v63 }
 0x205   :  { %v688_v38 = vadd.f32 %v687_v7, %v686_v50  ;;  %v629_v40 = vrot.slane %v628_v30, 1  ;;  %v640_v12 = vadd.f32 %v639_v39, %v638_v6  ;;  %v678_v46 = vadd.f32 %v677_v37, %v676_v25 }
 0x206   :  { %v934_v13 = vpop.eup %933  ;;  %v631_v29 = vrot.slane %v590_v60, 4  ;;  %v683_v44 = vrot.slane %v682_v1, 1  ;;  %v728_v54 = vsel %vm715_vm2, %v666_v49, %v727_v51  ;;  %v672_v5 = vadd.f32 %v671_v19, %v670_v23 }
 0x207   :  { %v584_v24 = vmul.f32 %v934_v13, %v1267_v45  ;;  %v689_v61 = vrot.slane %v688_v38, 1  ;;  %v630_v14 = vadd.f32 %v629_v40, %v628_v30  ;;  %v624_v62 = vadd.f32 %v623_v18, %v622_v16 }
 0x208   :  { %v632_v31 = vadd.f32 %v631_v29, %v590_v60  ;;  %v684_v58 = vadd.f32 %v683_v44, %v682_v1  ;;  %v729_v27 = vsel %vm717_vm3, %v672_v5, %v728_v54  ;;  %v641_v15 = vrot.slane %v640_v12, 1 }
 0x209   :  { %v936_v10 = vpop.eup %935  ;;  %v600_v43 = vmul.f32 %v938_v42, %v584_v24  ;;  %v730_v59 = vsel %vm719_vm4, %v678_v46, %v729_v27  ;;  %v690_v50 = vadd.f32 %v689_v61, %v688_v38 }
 0x20a   :  { %v576_v47 = vmul.f32 %v936_v10, %v1276_v41  ;;  %v633_v45 = vrot.slane %v632_v31, 2  ;;  %v714_v41 = vsel %vm713_vm1, %v612_v17, %v606_v22  ;;  %v731_v6 = vsel %vm721_vm5, %v684_v58, %v730_v59 }
 0x20b   :  { %v691_v2 = vrot.slane %v600_v43, 4  ;;  %v716_v21 = vsel %vm715_vm2, %v618_v0, %v714_v41  ;;  %v732_v13 = vsel %vm723_vm6, %v690_v50, %v731_v6  ;;  %v642_v22 = vadd.f32 %v641_v15, %v640_v12 }
 0x20c   :  { %v592_v56 = vmul.f32 %v939_v32, %v576_v47  ;;  %v634_v34 = vadd.f32 %v633_v45, %v632_v31  ;;  %v718_v3 = vsel %vm717_vm3, %v624_v62, %v716_v21 }
 0x20d   :  { %v692_v9 = vadd.f32 %v691_v2, %v600_v43  ;;  %v720_v11 = vsel %vm719_vm4, %v630_v14, %v718_v3 }
 0x20e   :  { %v643_v57 = vrot.slane %v592_v56, 4  ;;  %v635_v26 = vrot.slane %v634_v34, 1 }
 0x20f   :  { %v693_v28 = vrot.slane %v692_v9, 2 }
 0x210   :  { %v644_v53 = vadd.f32 %v643_v57, %v592_v56  ;;  %v636_v52 = vadd.f32 %v635_v26, %v634_v34 }
 0x211   :  { %v694_v8 = vadd.f32 %v693_v28, %v692_v9 }
 0x212   :  { %v645_v4 = vrot.slane %v644_v53, 2  ;;  %v722_v35 = vsel %vm721_vm5, %v636_v52, %v720_v11 }
 0x213   :  { %v695_v55 = vrot.slane %v694_v8, 1  ;;  %v724_v25 = vsel %vm723_vm6, %v642_v22, %v722_v35 }
 0x214   :  { %v646_v63 = vadd.f32 %v645_v4, %v644_v53 }
 0x215   :  { %v696_v60 = vadd.f32 %v695_v55, %v694_v8 }
 0x216   :  { %v647_v36 = vrot.slane %v646_v63, 1 }
 0x217   :  { %v733_v16 = vsel %vm725_vm7, %v696_v60, %v732_v13 }
 0x218   :  { %v648_v23 = vadd.f32 %v647_v36, %v646_v63  ;;  %737 = vst [vmem:[#allocation5 + $0x8] sm:$0xff] %v733_v16 }
 0x21a   :  { %v726_v24 = vsel %vm725_vm7, %v648_v23, %v724_v25 }
 0x21b   :  { %736 = vst [vmem:[#allocation5] sm:$0xff] %v726_v24 }
 0x21c   :  { %973 = shalt.err (!%p970_p12)
}
 0x21d   :  { %s974_s24 = scalar_lea.hbm %s1327_s4, 256 }
 0x21e   :  { %p975_p13 = scmp.ne.s32.totalorder %s1327_s4, %s974_s24  ;;  %p978_p0 = scmp.lt.u32.totalorder %s974_s24, %s1327_s4 }
 0x220   :  { %p980_p1 = pnand %p978_p0, %p975_p13 }
 0x222   :  { %983 = shalt.err (!%p980_p1)
}
 0x223   :  { %749 = dma.vmem_to_hbm [thread:$0]  %s744_s20, 256, %s1327_s4, [#allocation4], %s989_s25, %s989_s25, %s990_s26  }
 0x224   :  { %986 = dma.done.wait [#allocation4], 256  }
 0x225   :  { %987 = vsyncadd [#allocation4], 4294967040 }
 0x226   :  { %753 = vsyncpa [#allocation3], 1 }
 0x227   :  { %754 = vsyncpa [#allocation4], 1 }

</bundles_post_ra>
